<compile_context>
chip_gen: v7x
topology: tpu7x:2x2x1
jax: 0.10.0
libtpu: 0.0.40
codegen_flags: <defaults>
</compile_context>

<pallas_src>
import jax
import jax.numpy as jnp
from jax.experimental import pallas as pl
from jax.experimental.pallas import tpu as pltpu

_LANE = 128
_SUBLANE = 8


def _round_up(v, m):
    return ((v + m - 1) // m) * m


def _pad2(a, rows, cols, dtype=None):
    dtype = a.dtype if dtype is None else dtype
    return jnp.zeros((rows, cols), dtype).at[:a.shape[0], :a.shape[1]].set(a.astype(dtype))


def _pad_bias(b, cols, dtype=jnp.float32):
    return jnp.zeros((1, cols), dtype).at[0, :b.shape[0]].set(b.astype(dtype))


def _pad_col(v, rows, dtype=jnp.float32):
    return jnp.zeros((rows, 1), dtype).at[:v.shape[0], 0].set(v.astype(dtype))


def _vmem_cap_bytes():
    # ~85% of physical per-core VMEM; conservative (v7x-safe) default on failure.
    try:
        return int(pltpu.get_tpu_info().vmem_capacity_bytes * 0.85)
    except Exception:
        return 56 << 20


def _vmem_limit(footprint_bytes):
    want = int(footprint_bytes * 1.25) + (4 << 20)
    return int(min(max(want, 32 << 20), _vmem_cap_bytes()))


def _spec(block_shape, index_map, single_buffer):
    # Resident (constant index_map) inputs: request a single VMEM buffer so the
    # default double buffer does not waste VMEM (A_hat is the big one).
    if single_buffer:
        return pl.BlockSpec(block_shape, index_map, pipeline_mode=pl.Buffered(1))
    return pl.BlockSpec(block_shape, index_map)


# ----------------------------------------------------------------------------
# Kernel A: fused ClusterGCN branch (all conv layers + relu(Linear) + mean-pool)
# ----------------------------------------------------------------------------
def _gcn_branch_kernel(a_ref, invdeg_ref, x_ref, w_ref, b_ref,
                       gw_ref, gb_ref, pool_ref, invcnt_ref, o_ref, h_scr):
    l = pl.program_id(0)

    @pl.when(l == 0)
    def _():
        h_scr[...] = x_ref[...]

    h_bf = h_scr[...]                                    # bf16 activations
    # (A + I) @ h on the MXU, then exact f32 row scaling by D^-1 (A+I is kept
    # integer-exact in bf16; normalization never gets quantized).
    agg = jnp.dot(a_ref[...], h_bf, preferred_element_type=jnp.float32)
    agg = agg * invdeg_ref[...]
    # Fused K=2D matmul: [D^-1(A+I)h , h] @ [W_out ; W_root] in one MXU call.
    hcat = jnp.concatenate([agg.astype(jnp.bfloat16), h_bf], axis=1)
    y = jnp.dot(hcat, w_ref[...], preferred_element_type=jnp.float32) + b_ref[...]
    h_scr[...] = y.astype(jnp.bfloat16)

    # Epilogue on the last conv layer: relu(Linear) + global_mean_pool, in VMEM.
    @pl.when(l == pl.num_programs(0) - 1)
    def _():
        h1 = jnp.dot(h_scr[...], gw_ref[...], preferred_element_type=jnp.float32)
        h1 = jnp.maximum(h1 + gb_ref[...], 0.0)
        pooled = jnp.dot(pool_ref[...], h1.astype(jnp.bfloat16),
                         preferred_element_type=jnp.float32)
        o_ref[...] = pooled * invcnt_ref[...]            # exact mean-pool scale


# ----------------------------------------------------------------------------
# Kernel B: fused dense head (MLP branch + predictor + final Linear)
# ----------------------------------------------------------------------------
def _make_head_kernel(n_mlp, n_pred_rest):
    def kernel(*refs):
        o_ref = refs[-1]
        it = iter(refs[:-1])
        h1_ref = next(it)
        mol_ref = next(it)
        mlp = [(next(it), next(it)) for _ in range(n_mlp)]
        wp1_ref = next(it); bp1_ref = next(it)
        pred = [(next(it), next(it)) for _ in range(n_pred_rest)]
        wo_ref = next(it); bo_ref = next(it)

        def dense(xv, w_ref, b_ref, relu):
            y = jnp.dot(xv.astype(jnp.bfloat16), w_ref[...],
                        preferred_element_type=jnp.float32) + b_ref[...]
            return jnp.maximum(y, 0.0) if relu else y

        # MLP branch: relu after every layer (incl. the last), as in the module.
        h2 = mol_ref[...]
        for (w, b) in mlp:
            h2 = dense(h2, w, b, relu=True)

        # Predictor layer 0 on concat(h1, h2) via one stacked-K matmul.
        hcat = jnp.concatenate([h1_ref[...].astype(jnp.bfloat16),
                                h2.astype(jnp.bfloat16)], axis=1)
        h = jnp.maximum(
            jnp.dot(hcat, wp1_ref[...], preferred_element_type=jnp.float32)
            + bp1_ref[...], 0.0)
        for (w, b) in pred:
            h = dense(h, w, b, relu=True)

        # Final Linear(pred_hid, 1) folded into the epilogue; lane-dense 128-wide
        # output block, column 0 carries the logit.
        o_ref[...] = dense(h, wo_ref, bo_ref, relu=False)

    return kernel


# ----------------------------------------------------------------------------
# Deterministic parameter init (PyTorch-Linear-style uniform bounds)
# ----------------------------------------------------------------------------
def _linear_init(key, fan_in, fan_out, bias=True):
    kw, kb = jax.random.split(key)
    bound = 1.0 / float(fan_in) ** 0.5
    w = jax.random.uniform(kw, (fan_in, fan_out), jnp.float32, -bound, bound)
    if not bias:
        return w
    b = jax.random.uniform(kb, (fan_out,), jnp.float32, -bound, bound)
    return w, b


def init_params(key, n_gcn_inputs, n_gcn_hiddens, n_gcn_layers, n_gcn_outputs,
                n_mlp_inputs, n_mlp_hiddens, n_mlp_layers, n_mlp_outputs,
                n_predictor_hiddens, n_predictor_layers):
    params = {"conv": [], "mlp": [], "predictor": []}
    keys = iter(jax.random.split(key, 128))

    # GCN branch: ClusterGCNConv(in,hid), ClusterGCNConv(hid,hid)*(L-1), Linear(hid,out)
    conv_dims = [(n_gcn_inputs, n_gcn_hiddens)] + \
                [(n_gcn_hiddens, n_gcn_hiddens)] * (n_gcn_layers - 1)
    for (fi, fo) in conv_dims:
        w_out, b = _linear_init(next(keys), fi, fo)             # lin_out (with bias)
        w_root = _linear_init(next(keys), fi, fo, bias=False)   # lin_root (no bias)
        params["conv"].append((w_out, w_root, b))
    params["gcn_out"] = _linear_init(next(keys), n_gcn_hiddens, n_gcn_outputs)

    # MLP branch
    mlp_dims = [(n_mlp_inputs, n_mlp_hiddens)] + \
               [(n_mlp_hiddens, n_mlp_hiddens)] * (n_mlp_layers - 1) + \
               [(n_mlp_hiddens, n_mlp_outputs)]
    for (fi, fo) in mlp_dims:
        params["mlp"].append(_linear_init(next(keys), fi, fo))

    # Predictor
    pred_dims = [(n_gcn_outputs + n_mlp_outputs, n_predictor_hiddens)] + \
                [(n_predictor_hiddens, n_predictor_hiddens)] * (n_predictor_layers - 1)
    for (fi, fo) in pred_dims:
        params["predictor"].append(_linear_init(next(keys), fi, fo))
    # TODO(synk): n_predictor_layers == 0 path (out acts on concat directly) not wired.
    params["out"] = _linear_init(next(keys), n_predictor_hiddens, 1)
    return params


# ----------------------------------------------------------------------------
# Forward pass
# ----------------------------------------------------------------------------
def cluster_gcn_forward(params, x, edge_index, batch_index, mol_features, num_graphs):
    f32, bf16 = jnp.float32, jnp.bfloat16
    num_nodes, n_in = x.shape
    conv = params["conv"]
    n_hid = conv[0][0].shape[1]
    gw, gb = params["gcn_out"]
    n_gcn_out = gw.shape[1]
    n_mlp_out = params["mlp"][-1][0].shape[1]

    # Padded sizes (lane-dense feature axes, sublane-aligned row axes).
    Np = _round_up(num_nodes, _LANE)
    D = _round_up(max(n_in, n_hid), _LANE)
    Dg = _round_up(n_gcn_out, _LANE)
    # Kernel B row tile: one grid step for small graph batches, full-M 128-row
    # tiles for large batches.
    TG = _LANE if num_graphs > 512 else _round_up(max(num_graphs, 1), _SUBLANE)
    Gp = _round_up(max(num_graphs, 1), TG)

    # ---- plain-JAX glue: (A + I) counts, D^-1, mean-pool one-hots --------------
    # TODO(synk): for ClusterGCN-scale graphs replace the dense O(N^2) adjacency +
    # dense aggregation with an edge-list segment-sum kernel (PrefetchScalarGridSpec
    # over edges sorted by destination, scalar-prefetched row offsets).
    src, dst = edge_index[0], edge_index[1]
    not_self = (src != dst).astype(f32)            # PyG removes then re-adds self loops
    adj = jnp.zeros((num_nodes, num_nodes), f32).at[dst, src].add(not_self)
    adj = adj + jnp.eye(num_nodes, dtype=f32)
    inv_deg = 1.0 / adj.sum(axis=1)

    onehot = (batch_index[None, :] == jnp.arange(num_graphs)[:, None]).astype(f32)
    inv_cnt = 1.0 / jnp.maximum(onehot.sum(axis=1), 1.0)

    # Integer-exact matrices in bf16; normalizations stay f32 (applied in-kernel).
    adj_p = _pad2(adj, Np, Np, bf16)
    invdeg_p = _pad_col(inv_deg, Np)
    x_p = _pad2(x, Np, D, bf16)
    pool_p = _pad2(onehot, Gp, Np, bf16)
    invcnt_p = _pad_col(inv_cnt, Gp)

    L = len(conv)
    # Per-layer weights pre-stacked as [W_out ; W_root] -> one K=2D MXU call/layer.
    w_stack = jnp.stack([
        jnp.concatenate([_pad2(w_o, D, D, bf16), _pad2(w_r, D, D, bf16)], axis=0)
        for (w_o, w_r, _) in conv])                               # (L, 2D, D)
    b_stack = jnp.stack([_pad_bias(b, D) for (_, _, b) in conv])  # (L, 1, D)
    gw_p = _pad2(gw, D, Dg, bf16)
    gb_p = _pad_bias(gb, Dg)

    # VMEM footprint estimate (worst-case double-buffered residents so the
    # fallback path also fits), streamed layer blocks, scratch, concat temp, out.
    fp_a = (2 * (Np * Np * 2 + Np * _LANE * 4 + Np * D * 2 + D * Dg * 2
                 + _SUBLANE * Dg * 4 + Gp * Np * 2 + Gp * _LANE * 4)
            + 2 * (2 * D) * D * 2 + 2 * _SUBLANE * D * 4
            + Np * D * 2 + Np * 2 * D * 2
            + 2 * Gp * Dg * 4)
    ce_a = pl.CostEstimate(
        flops=int(2 * L * (Np * Np * D + Np * (2 * D) * D)
                  + 2 * Np * D * Dg + 2 * Gp * Np * Dg),
        transcendentals=0,
        bytes_accessed=int(Np * Np * 2 + Np * D * 2 + L * ((2 * D) * D * 2 + D * 4)
                           + D * Dg * 2 + Gp * Np * 2 + Gp * Dg * 4 + Np * 4 + Gp * 4))

    # ---- Kernel A: whole GCN branch, grid over conv layers ---------------------
    # TODO(synk): row-tile A_hat ((TN, Np) blocks over a leading grid axis) once
    # Np^2 bf16 no longer fits VMEM, and shard that axis across both TensorCores
    # on v7x ("parallel" semantics).
    def run_gcn_branch(single_buffer):
        return pl.pallas_call(
            _gcn_branch_kernel,
            grid=(L,),
            out_shape=jax.ShapeDtypeStruct((Gp, Dg), f32),
            in_specs=[
                _spec((Np, Np), lambda l: (0, 0), single_buffer),     # A + I (resident)
                _spec((Np, 1), lambda l: (0, 0), single_buffer),      # 1/deg (resident)
                _spec((Np, D), lambda l: (0, 0), single_buffer),      # x (resident)
                pl.BlockSpec((None, 2 * D, D), lambda l: (l, 0, 0)),  # [W_out;W_root][l]
                pl.BlockSpec((None, 1, D), lambda l: (l, 0, 0)),      # bias[l]
                _spec((D, Dg), lambda l: (0, 0), single_buffer),      # gcn_out W
                _spec((1, Dg), lambda l: (0, 0), single_buffer),      # gcn_out b
                _spec((Gp, Np), lambda l: (0, 0), single_buffer),     # pool one-hots
                _spec((Gp, 1), lambda l: (0, 0), single_buffer),      # 1/|graph|
            ],
            out_specs=pl.BlockSpec((Gp, Dg), lambda l: (0, 0)),
            scratch_shapes=[pltpu.VMEM((Np, D), bf16)],               # bf16 activations
            compiler_params=pltpu.CompilerParams(
                dimension_semantics=("arbitrary",),
                vmem_limit_bytes=_vmem_limit(fp_a)),
            cost_estimate=ce_a,
        )(adj_p, invdeg_p, x_p, w_stack, b_stack, gw_p, gb_p, pool_p, invcnt_p)

    try:
        h1 = run_gcn_branch(True)
    except Exception:
        # pl.Buffered(1) single-buffering unsupported on this jax/libtpu:
        # fall back to default double-buffered resident inputs.
        h1 = run_gcn_branch(False)

    # ---- Kernel B: fused MLP + predictor + out, row-tiled over graphs ----------
    Dm_in = _round_up(mol_features.shape[1], _LANE)
    Dm_out = _round_up(n_mlp_out, _LANE)
    Dp = _round_up(params["predictor"][0][0].shape[1], _LANE)
    Do = _LANE

    mol_p = _pad2(mol_features, Gp, Dm_in, bf16)

    mlp_ops = []
    for (w, b) in params["mlp"]:
        kp = _round_up(w.shape[0], _LANE)
        np_ = _round_up(w.shape[1], _LANE)
        mlp_ops.append((_pad2(w, kp, np_, bf16), _pad_bias(b, np_)))

    wp1, bp1 = params["predictor"][0]
    # Split first-predictor weight along concat(h1, h2) and stack -> one matmul.
    wp1_stack = jnp.concatenate([_pad2(wp1[:n_gcn_out], Dg, Dp, bf16),
                                 _pad2(wp1[n_gcn_out:], Dm_out, Dp, bf16)], axis=0)
    bp1_p = _pad_bias(bp1, Dp)
    pred_rest = [(_pad2(w, Dp, Dp, bf16), _pad_bias(b, Dp))
                 for (w, b) in params["predictor"][1:]]

    wo, bo = params["out"]
    wo_p = _pad2(wo, Dp, Do, bf16)
    bo_p = _pad_bias(bo, Do)

    flat_weights = []
    for (w, b) in mlp_ops:
        flat_weights += [w, b]
    flat_weights += [wp1_stack, bp1_p]
    for (w, b) in pred_rest:
        flat_weights += [w, b]
    flat_weights += [wo_p, bo_p]

    w_bytes = sum(int(w.size) * w.dtype.itemsize for w in flat_weights)
    fp_b = 2 * (w_bytes + TG * Dg * 4 + TG * Dm_in * 2 + TG * Do * 4)

    head_kernel = _make_head_kernel(len(params["mlp"]), len(pred_rest))

    def run_head(single_buffer):
        w_specs = [_spec(w.shape, lambda g: (0, 0), single_buffer)
                   for w in flat_weights]
        return pl.pallas_call(
            head_kernel,
            grid=(Gp // TG,),
            out_shape=jax.ShapeDtypeStruct((Gp, Do), f32),
            in_specs=[pl.BlockSpec((TG, Dg), lambda g: (g, 0)),
                      pl.BlockSpec((TG, Dm_in), lambda g: (g, 0))] + w_specs,
            out_specs=pl.BlockSpec((TG, Do), lambda g: (g, 0)),
            compiler_params=pltpu.CompilerParams(
                dimension_semantics=("parallel",),
                vmem_limit_bytes=_vmem_limit(fp_b)),
        )(h1, mol_p, *flat_weights)

    try:
        out_p = run_head(True)
    except Exception:
        out_p = run_head(False)

    # Padded graph rows pick up bias/ReLU garbage -- keep this slice.
    return out_p[:num_graphs, :1]


# ----------------------------------------------------------------------------
if __name__ == "__main__":
    key = jax.random.PRNGKey(0)
    k_x, k_src, k_dst, k_mol, k_params = jax.random.split(key, 5)

    # Small, deterministic example sizes consistent with the module.
    num_nodes, num_edges, num_graphs = 12, 24, 2
    n_gcn_inputs, n_gcn_hiddens, n_gcn_layers, n_gcn_outputs = 16, 32, 2, 16
    n_mlp_inputs, n_mlp_hiddens, n_mlp_layers, n_mlp_outputs = 8, 32, 2, 16
    n_predictor_hiddens, n_predictor_layers = 32, 2

    x = jax.random.normal(k_x, (num_nodes, n_gcn_inputs), jnp.float32)
    src = jax.random.randint(k_src, (num_edges,), 0, num_nodes, jnp.int32)
    dst = jax.random.randint(k_dst, (num_edges,), 0, num_nodes, jnp.int32)
    edge_index = jnp.stack([src, dst])                       # [2, E]
    batch_index = jnp.array([0] * 6 + [1] * 6, jnp.int32)    # [num_nodes]
    mol_features = jax.random.normal(k_mol, (num_graphs, n_mlp_inputs), jnp.float32)

    params = init_params(
        k_params,
        n_gcn_inputs, n_gcn_hiddens, n_gcn_layers, n_gcn_outputs,
        n_mlp_inputs, n_mlp_hiddens, n_mlp_layers, n_mlp_outputs,
        n_predictor_hiddens, n_predictor_layers,
    )

    out = cluster_gcn_forward(params, x, edge_index, batch_index,
                              mol_features, num_graphs)
    out = jax.block_until_ready(out)
    assert out.shape == (num_graphs, 1)
    assert bool(jnp.all(jnp.isfinite(out)))
    print("KERNEL_OK")
</pallas_src>

<mosaic_0001>
module attributes {stable_mosaic.version = 11 : i64} {
  func.func @_gcn_branch_kernel(%arg0: i32, %arg1: memref<128x128xbf16, #tpu.memory_space<vmem>>, %arg2: memref<128x1xf32, #tpu.memory_space<vmem>>, %arg3: memref<128x128xbf16, #tpu.memory_space<vmem>>, %arg4: memref<1x256x128xbf16, #tpu.memory_space<vmem>>, %arg5: memref<1x1x128xf32, #tpu.memory_space<vmem>>, %arg6: memref<128x128xbf16, #tpu.memory_space<vmem>>, %arg7: memref<1x128xf32, #tpu.memory_space<vmem>>, %arg8: memref<8x128xbf16, #tpu.memory_space<vmem>>, %arg9: memref<8x1xf32, #tpu.memory_space<vmem>>, %arg10: memref<8x128xf32, #tpu.memory_space<vmem>>, %arg11: memref<128x128xbf16, #tpu.memory_space<vmem>>) attributes {dimension_semantics = [#tpu.dimension_semantics<arbitrary>], iteration_bounds = array<i64: 2>, scalar_prefetch = 0 : i64, scratch_operands = 1 : i64, tpu.core_type = #tpu.core_type<tc>, window_params = [{pipeline_mode = #tpu.pipeline_mode<synchronous>, transform_indices = @transform_0, window_bounds = array<i64: 128, 128>}, {pipeline_mode = #tpu.pipeline_mode<synchronous>, transform_indices = @transform_1, window_bounds = array<i64: 128, 1>}, {pipeline_mode = #tpu.pipeline_mode<synchronous>, transform_indices = @transform_2, window_bounds = array<i64: 128, 128>}, {transform_indices = @transform_3, window_bounds = array<i64: 1, 256, 128>}, {transform_indices = @transform_4, window_bounds = array<i64: 1, 1, 128>}, {pipeline_mode = #tpu.pipeline_mode<synchronous>, transform_indices = @transform_5, window_bounds = array<i64: 128, 128>}, {pipeline_mode = #tpu.pipeline_mode<synchronous>, transform_indices = @transform_6, window_bounds = array<i64: 1, 128>}, {pipeline_mode = #tpu.pipeline_mode<synchronous>, transform_indices = @transform_7, window_bounds = array<i64: 8, 128>}, {pipeline_mode = #tpu.pipeline_mode<synchronous>, transform_indices = @transform_8, window_bounds = array<i64: 8, 1>}, {pipeline_mode = #tpu.pipeline_mode<synchronous>, transform_indices = @transform_9, window_bounds = array<i64: 8, 128>}]} {
    %c0_i32 = arith.constant 0 : i32
    %0 = arith.cmpi eq, %arg0, %c0_i32 : i32
    %1 = arith.extui %0 : i1 to i32
    %c0_i32_0 = arith.constant 0 : i32
    %2 = arith.cmpi ne, %1, %c0_i32_0 : i32
    scf.if %2 {
      %c0_16 = arith.constant 0 : index
      %c0_17 = arith.constant 0 : index
      %23 = vector.load %arg3[%c0_16, %c0_17] : memref<128x128xbf16, #tpu.memory_space<vmem>>, vector<128x128xbf16>
      %c0_18 = arith.constant 0 : index
      %c0_19 = arith.constant 0 : index
      %24 = vector.load %arg11[%c0_18, %c0_19] : memref<128x128xbf16, #tpu.memory_space<vmem>>, vector<128x128xbf16>
      tpu.vector_store %arg11[%c0_18, %c0_19], %23 {strides = array<i32>} : memref<128x128xbf16, #tpu.memory_space<vmem>>, vector<128x128xbf16>,
    } else {
    }
    %c0 = arith.constant 0 : index
    %c0_1 = arith.constant 0 : index
    %3 = vector.load %arg11[%c0, %c0_1] : memref<128x128xbf16, #tpu.memory_space<vmem>>, vector<128x128xbf16>
    %c0_2 = arith.constant 0 : index
    %c0_3 = arith.constant 0 : index
    %4 = vector.load %arg1[%c0_2, %c0_3] : memref<128x128xbf16, #tpu.memory_space<vmem>>, vector<128x128xbf16>
    %cst = arith.constant dense<0.000000e+00> : vector<128x128xf32>
    %5 = tpu.matmul %4, %3, %cst {dimension_numbers = #tpu.dot_dimension_numbers<[1], [0], [0], [1], [0, 0, 1, 1], [], []>} : vector<128x128xbf16>, vector<128x128xbf16>, vector<128x128xf32> -> vector<128x128xf32>
    %c0_4 = arith.constant 0 : index
    %c0_5 = arith.constant 0 : index
    %6 = vector.load %arg2[%c0_4, %c0_5] : memref<128x1xf32, #tpu.memory_space<vmem>>, vector<128x1xf32>
    %7 = vector.broadcast %6 : vector<128x1xf32> to vector<128x128xf32>
    %8 = arith.mulf %5, %7 : vector<128x128xf32>
    %9 = arith.truncf %8 : vector<128x128xf32> to vector<128x128xbf16>
    %10 = tpu.concatenate %9, %3 in 1 : vector<128x128xbf16>, vector<128x128xbf16> -> vector<128x256xbf16>
    %c0_6 = arith.constant 0 : index
    %c0_7 = arith.constant 0 : index
    %c0_8 = arith.constant 0 : index
    %11 = vector.load %arg4[%c0_6, %c0_7, %c0_8] : memref<1x256x128xbf16, #tpu.memory_space<vmem>>, vector<1x256x128xbf16>
    %12 = vector.shape_cast %11 : vector<1x256x128xbf16> to vector<256x128xbf16>
    %cst_9 = arith.constant dense<0.000000e+00> : vector<128x128xf32>
    %13 = tpu.matmul %10, %12, %cst_9 {dimension_numbers = #tpu.dot_dimension_numbers<[1], [0], [0], [1], [0, 0, 1, 1], [], []>} : vector<128x256xbf16>, vector<256x128xbf16>, vector<128x128xf32> -> vector<128x128xf32>
    %c0_10 = arith.constant 0 : index
    %c0_11 = arith.constant 0 : index
    %c0_12 = arith.constant 0 : index
    %14 = vector.load %arg5[%c0_10, %c0_11, %c0_12] : memref<1x1x128xf32, #tpu.memory_space<vmem>>, vector<1x1x128xf32>
    %15 = vector.shape_cast %14 : vector<1x1x128xf32> to vector<1x128xf32>
    %16 = vector.broadcast %15 : vector<1x128xf32> to vector<128x128xf32>
    %17 = arith.addf %13, %16 : vector<128x128xf32>
    %18 = arith.truncf %17 : vector<128x128xf32> to vector<128x128xbf16>
    %c0_13 = arith.constant 0 : index
    %c0_14 = arith.constant 0 : index
    %19 = vector.load %arg11[%c0_13, %c0_14] : memref<128x128xbf16, #tpu.memory_space<vmem>>, vector<128x128xbf16>
    tpu.vector_store %arg11[%c0_13, %c0_14], %18 {strides = array<i32>} : memref<128x128xbf16, #tpu.memory_space<vmem>>, vector<128x128xbf16>,
    %c1_i32 = arith.constant 1 : i32
    %20 = arith.cmpi eq, %arg0, %c1_i32 : i32
    %21 = arith.extui %20 : i1 to i32
    %c0_i32_15 = arith.constant 0 : i32
    %22 = arith.cmpi ne, %21, %c0_i32_15 : i32
    scf.if %22 {
      %c0_16 = arith.constant 0 : index
      %c0_17 = arith.constant 0 : index
      %23 = vector.load %arg11[%c0_16, %c0_17] : memref<128x128xbf16, #tpu.memory_space<vmem>>, vector<128x128xbf16>
      %c0_18 = arith.constant 0 : index
      %c0_19 = arith.constant 0 : index
      %24 = vector.load %arg6[%c0_18, %c0_19] : memref<128x128xbf16, #tpu.memory_space<vmem>>, vector<128x128xbf16>
      %cst_20 = arith.constant dense<0.000000e+00> : vector<128x128xf32>
      %25 = tpu.matmul %23, %24, %cst_20 {dimension_numbers = #tpu.dot_dimension_numbers<[1], [0], [0], [1], [0, 0, 1, 1], [], []>} : vector<128x128xbf16>, vector<128x128xbf16>, vector<128x128xf32> -> vector<128x128xf32>
      %c0_21 = arith.constant 0 : index
      %c0_22 = arith.constant 0 : index
      %26 = vector.load %arg7[%c0_21, %c0_22] : memref<1x128xf32, #tpu.memory_space<vmem>>, vector<1x128xf32>
      %27 = vector.broadcast %26 : vector<1x128xf32> to vector<128x128xf32>
      %28 = arith.addf %25, %27 : vector<128x128xf32>
      %cst_23 = arith.constant 0.000000e+00 : f32
      %29 = vector.broadcast %cst_23 : f32 to vector<128x128xf32>
      %30 = arith.maximumf %28, %29 : vector<128x128xf32>
      %c0_24 = arith.constant 0 : index
      %c0_25 = arith.constant 0 : index
      %31 = vector.load %arg8[%c0_24, %c0_25] : memref<8x128xbf16, #tpu.memory_space<vmem>>, vector<8x128xbf16>
      %32 = arith.truncf %30 : vector<128x128xf32> to vector<128x128xbf16>
      %cst_26 = arith.constant dense<0.000000e+00> : vector<8x128xf32>
      %33 = tpu.matmul %31, %32, %cst_26 {dimension_numbers = #tpu.dot_dimension_numbers<[1], [0], [0], [1], [0, 0, 1, 1], [], []>} : vector<8x128xbf16>, vector<128x128xbf16>, vector<8x128xf32> -> vector<8x128xf32>
      %c0_27 = arith.constant 0 : index
      %c0_28 = arith.constant 0 : index
      %34 = vector.load %arg9[%c0_27, %c0_28] : memref<8x1xf32, #tpu.memory_space<vmem>>, vector<8x1xf32>
      %35 = vector.broadcast %34 : vector<8x1xf32> to vector<8x128xf32>
      %36 = arith.mulf %33, %35 : vector<8x128xf32>
      %c0_29 = arith.constant 0 : index
      %c0_30 = arith.constant 0 : index
      %37 = vector.load %arg10[%c0_29, %c0_30] : memref<8x128xf32, #tpu.memory_space<vmem>>, vector<8x128xf32>
      tpu.vector_store %arg10[%c0_29, %c0_30], %36 {strides = array<i32>} : memref<8x128xf32, #tpu.memory_space<vmem>>, vector<8x128xf32>,
    } else {
    }
    return
  }
  func.func @transform_0(%arg0: i32) -> (i32, i32) {
    %c0_i32 = arith.constant 0 : i32
    %c0_i32_0 = arith.constant 0 : i32
    %c0_i32_1 = arith.constant 0 : i32
    return %c0_i32, %c0_i32_0 : i32, i32
  }
  func.func @transform_1(%arg0: i32) -> (i32, i32) {
    %c0_i32 = arith.constant 0 : i32
    %c0_i32_0 = arith.constant 0 : i32
    %c0_i32_1 = arith.constant 0 : i32
    return %c0_i32, %c0_i32_0 : i32, i32
  }
  func.func @transform_2(%arg0: i32) -> (i32, i32) {
    %c0_i32 = arith.constant 0 : i32
    %c0_i32_0 = arith.constant 0 : i32
    %c0_i32_1 = arith.constant 0 : i32
    return %c0_i32, %c0_i32_0 : i32, i32
  }
  func.func @transform_3(%arg0: i32) -> (i32, i32, i32) {
    %c0_i32 = arith.constant 0 : i32
    %c0_i32_0 = arith.constant 0 : i32
    %c0_i32_1 = arith.constant 0 : i32
    return %arg0, %c0_i32, %c0_i32_0 : i32, i32, i32
  }
  func.func @transform_4(%arg0: i32) -> (i32, i32, i32) {
    %c0_i32 = arith.constant 0 : i32
    %c0_i32_0 = arith.constant 0 : i32
    %c0_i32_1 = arith.constant 0 : i32
    return %arg0, %c0_i32, %c0_i32_0 : i32, i32, i32
  }
  func.func @transform_5(%arg0: i32) -> (i32, i32) {
    %c0_i32 = arith.constant 0 : i32
    %c0_i32_0 = arith.constant 0 : i32
    %c0_i32_1 = arith.constant 0 : i32
    return %c0_i32, %c0_i32_0 : i32, i32
  }
  func.func @transform_6(%arg0: i32) -> (i32, i32) {
    %c0_i32 = arith.constant 0 : i32
    %c0_i32_0 = arith.constant 0 : i32
    %c0_i32_1 = arith.constant 0 : i32
    return %c0_i32, %c0_i32_0 : i32, i32
  }
  func.func @transform_7(%arg0: i32) -> (i32, i32) {
    %c0_i32 = arith.constant 0 : i32
    %c0_i32_0 = arith.constant 0 : i32
    %c0_i32_1 = arith.constant 0 : i32
    return %c0_i32, %c0_i32_0 : i32, i32
  }
  func.func @transform_8(%arg0: i32) -> (i32, i32) {
    %c0_i32 = arith.constant 0 : i32
    %c0_i32_0 = arith.constant 0 : i32
    %c0_i32_1 = arith.constant 0 : i32
    return %c0_i32, %c0_i32_0 : i32, i32
  }
  func.func @transform_9(%arg0: i32) -> (i32, i32) {
    %c0_i32 = arith.constant 0 : i32
    %c0_i32_0 = arith.constant 0 : i32
    %c0_i32_1 = arith.constant 0 : i32
    return %c0_i32, %c0_i32_0 : i32, i32
  }
}

module attributes {stable_mosaic.version = 11 : i64} {
  func.func @_gcn_branch_kernel(%arg0: i32, %arg1: memref<128x128xbf16, #tpu.memory_space<vmem>>, %arg2: memref<128x1xf32, #tpu.memory_space<vmem>>, %arg3: memref<128x128xbf16, #tpu.memory_space<vmem>>, %arg4: memref<1x256x128xbf16, #tpu.memory_space<vmem>>, %arg5: memref<1x1x128xf32, #tpu.memory_space<vmem>>, %arg6: memref<128x128xbf16, #tpu.memory_space<vmem>>, %arg7: memref<1x128xf32, #tpu.memory_space<vmem>>, %arg8: memref<8x128xbf16, #tpu.memory_space<vmem>>, %arg9: memref<8x1xf32, #tpu.memory_space<vmem>>, %arg10: memref<8x128xf32, #tpu.memory_space<vmem>>, %arg11: memref<128x128xbf16, #tpu.memory_space<vmem>>) attributes {dimension_semantics = [#tpu.dimension_semantics<arbitrary>], iteration_bounds = array<i64: 2>, scalar_prefetch = 0 : i64, scratch_operands = 1 : i64, tpu.core_type = #tpu.core_type<tc>, window_params = [{pipeline_mode = #tpu.pipeline_mode<synchronous>, transform_indices = @transform_0, window_bounds = array<i64: 128, 128>}, {pipeline_mode = #tpu.pipeline_mode<synchronous>, transform_indices = @transform_1, window_bounds = array<i64: 128, 1>}, {pipeline_mode = #tpu.pipeline_mode<synchronous>, transform_indices = @transform_2, window_bounds = array<i64: 128, 128>}, {transform_indices = @transform_3, window_bounds = array<i64: 1, 256, 128>}, {transform_indices = @transform_4, window_bounds = array<i64: 1, 1, 128>}, {pipeline_mode = #tpu.pipeline_mode<synchronous>, transform_indices = @transform_5, window_bounds = array<i64: 128, 128>}, {pipeline_mode = #tpu.pipeline_mode<synchronous>, transform_indices = @transform_6, window_bounds = array<i64: 1, 128>}, {pipeline_mode = #tpu.pipeline_mode<synchronous>, transform_indices = @transform_7, window_bounds = array<i64: 8, 128>}, {pipeline_mode = #tpu.pipeline_mode<synchronous>, transform_indices = @transform_8, window_bounds = array<i64: 8, 1>}, {pipeline_mode = #tpu.pipeline_mode<synchronous>, transform_indices = @transform_9, window_bounds = array<i64: 8, 128>}]} {
    %c0_i32 = arith.constant 0 : i32
    %0 = arith.cmpi eq, %arg0, %c0_i32 : i32
    %1 = arith.extui %0 : i1 to i32
    %c0_i32_0 = arith.constant 0 : i32
    %2 = arith.cmpi ne, %1, %c0_i32_0 : i32
    scf.if %2 {
      %c0_16 = arith.constant 0 : index
      %c0_17 = arith.constant 0 : index
      %23 = vector.load %arg3[%c0_16, %c0_17] : memref<128x128xbf16, #tpu.memory_space<vmem>>, vector<128x128xbf16>
      %c0_18 = arith.constant 0 : index
      %c0_19 = arith.constant 0 : index
      %24 = vector.load %arg11[%c0_18, %c0_19] : memref<128x128xbf16, #tpu.memory_space<vmem>>, vector<128x128xbf16>
      tpu.vector_store %arg11[%c0_18, %c0_19], %23 {strides = array<i32>} : memref<128x128xbf16, #tpu.memory_space<vmem>>, vector<128x128xbf16>,
    } else {
    }
    %c0 = arith.constant 0 : index
    %c0_1 = arith.constant 0 : index
    %3 = vector.load %arg11[%c0, %c0_1] : memref<128x128xbf16, #tpu.memory_space<vmem>>, vector<128x128xbf16>
    %c0_2 = arith.constant 0 : index
    %c0_3 = arith.constant 0 : index
    %4 = vector.load %arg1[%c0_2, %c0_3] : memref<128x128xbf16, #tpu.memory_space<vmem>>, vector<128x128xbf16>
    %cst = arith.constant dense<0.000000e+00> : vector<128x128xf32>
    %5 = tpu.matmul %4, %3, %cst {dimension_numbers = #tpu.dot_dimension_numbers<[1], [0], [0], [1], [0, 0, 1, 1], [], []>} : vector<128x128xbf16>, vector<128x128xbf16>, vector<128x128xf32> -> vector<128x128xf32>
    %c0_4 = arith.constant 0 : index
    %c0_5 = arith.constant 0 : index
    %6 = vector.load %arg2[%c0_4, %c0_5] : memref<128x1xf32, #tpu.memory_space<vmem>>, vector<128x1xf32>
    %7 = vector.broadcast %6 : vector<128x1xf32> to vector<128x128xf32>
    %8 = arith.mulf %5, %7 : vector<128x128xf32>
    %9 = arith.truncf %8 : vector<128x128xf32> to vector<128x128xbf16>
    %10 = tpu.concatenate %9, %3 in 1 : vector<128x128xbf16>, vector<128x128xbf16> -> vector<128x256xbf16>
    %c0_6 = arith.constant 0 : index
    %c0_7 = arith.constant 0 : index
    %c0_8 = arith.constant 0 : index
    %11 = vector.load %arg4[%c0_6, %c0_7, %c0_8] : memref<1x256x128xbf16, #tpu.memory_space<vmem>>, vector<1x256x128xbf16>
    %12 = vector.shape_cast %11 : vector<1x256x128xbf16> to vector<256x128xbf16>
    %cst_9 = arith.constant dense<0.000000e+00> : vector<128x128xf32>
    %13 = tpu.matmul %10, %12, %cst_9 {dimension_numbers = #tpu.dot_dimension_numbers<[1], [0], [0], [1], [0, 0, 1, 1], [], []>} : vector<128x256xbf16>, vector<256x128xbf16>, vector<128x128xf32> -> vector<128x128xf32>
    %c0_10 = arith.constant 0 : index
    %c0_11 = arith.constant 0 : index
    %c0_12 = arith.constant 0 : index
    %14 = vector.load %arg5[%c0_10, %c0_11, %c0_12] : memref<1x1x128xf32, #tpu.memory_space<vmem>>, vector<1x1x128xf32>
    %15 = vector.shape_cast %14 : vector<1x1x128xf32> to vector<1x128xf32>
    %16 = vector.broadcast %15 : vector<1x128xf32> to vector<128x128xf32>
    %17 = arith.addf %13, %16 : vector<128x128xf32>
    %18 = arith.truncf %17 : vector<128x128xf32> to vector<128x128xbf16>
    %c0_13 = arith.constant 0 : index
    %c0_14 = arith.constant 0 : index
    %19 = vector.load %arg11[%c0_13, %c0_14] : memref<128x128xbf16, #tpu.memory_space<vmem>>, vector<128x128xbf16>
    tpu.vector_store %arg11[%c0_13, %c0_14], %18 {strides = array<i32>} : memref<128x128xbf16, #tpu.memory_space<vmem>>, vector<128x128xbf16>,
    %c1_i32 = arith.constant 1 : i32
    %20 = arith.cmpi eq, %arg0, %c1_i32 : i32
    %21 = arith.extui %20 : i1 to i32
    %c0_i32_15 = arith.constant 0 : i32
    %22 = arith.cmpi ne, %21, %c0_i32_15 : i32
    scf.if %22 {
      %c0_16 = arith.constant 0 : index
      %c0_17 = arith.constant 0 : index
      %23 = vector.load %arg11[%c0_16, %c0_17] : memref<128x128xbf16, #tpu.memory_space<vmem>>, vector<128x128xbf16>
      %c0_18 = arith.constant 0 : index
      %c0_19 = arith.constant 0 : index
      %24 = vector.load %arg6[%c0_18, %c0_19] : memref<128x128xbf16, #tpu.memory_space<vmem>>, vector<128x128xbf16>
      %cst_20 = arith.constant dense<0.000000e+00> : vector<128x128xf32>
      %25 = tpu.matmul %23, %24, %cst_20 {dimension_numbers = #tpu.dot_dimension_numbers<[1], [0], [0], [1], [0, 0, 1, 1], [], []>} : vector<128x128xbf16>, vector<128x128xbf16>, vector<128x128xf32> -> vector<128x128xf32>
      %c0_21 = arith.constant 0 : index
      %c0_22 = arith.constant 0 : index
      %26 = vector.load %arg7[%c0_21, %c0_22] : memref<1x128xf32, #tpu.memory_space<vmem>>, vector<1x128xf32>
      %27 = vector.broadcast %26 : vector<1x128xf32> to vector<128x128xf32>
      %28 = arith.addf %25, %27 : vector<128x128xf32>
      %cst_23 = arith.constant 0.000000e+00 : f32
      %29 = vector.broadcast %cst_23 : f32 to vector<128x128xf32>
      %30 = arith.maximumf %28, %29 : vector<128x128xf32>
      %c0_24 = arith.constant 0 : index
      %c0_25 = arith.constant 0 : index
      %31 = vector.load %arg8[%c0_24, %c0_25] : memref<8x128xbf16, #tpu.memory_space<vmem>>, vector<8x128xbf16>
      %32 = arith.truncf %30 : vector<128x128xf32> to vector<128x128xbf16>
      %cst_26 = arith.constant dense<0.000000e+00> : vector<8x128xf32>
      %33 = tpu.matmul %31, %32, %cst_26 {dimension_numbers = #tpu.dot_dimension_numbers<[1], [0], [0], [1], [0, 0, 1, 1], [], []>} : vector<8x128xbf16>, vector<128x128xbf16>, vector<8x128xf32> -> vector<8x128xf32>
      %c0_27 = arith.constant 0 : index
      %c0_28 = arith.constant 0 : index
      %34 = vector.load %arg9[%c0_27, %c0_28] : memref<8x1xf32, #tpu.memory_space<vmem>>, vector<8x1xf32>
      %35 = vector.broadcast %34 : vector<8x1xf32> to vector<8x128xf32>
      %36 = arith.mulf %33, %35 : vector<8x128xf32>
      %c0_29 = arith.constant 0 : index
      %c0_30 = arith.constant 0 : index
      %37 = vector.load %arg10[%c0_29, %c0_30] : memref<8x128xf32, #tpu.memory_space<vmem>>, vector<8x128xf32>
      tpu.vector_store %arg10[%c0_29, %c0_30], %36 {strides = array<i32>} : memref<8x128xf32, #tpu.memory_space<vmem>>, vector<8x128xf32>,
    } else {
    }
    return
  }
  func.func @transform_0(%arg0: i32) -> (i32, i32) {
    %c0_i32 = arith.constant 0 : i32
    %c0_i32_0 = arith.constant 0 : i32
    %c0_i32_1 = arith.constant 0 : i32
    return %c0_i32, %c0_i32_0 : i32, i32
  }
  func.func @transform_1(%arg0: i32) -> (i32, i32) {
    %c0_i32 = arith.constant 0 : i32
    %c0_i32_0 = arith.constant 0 : i32
    %c0_i32_1 = arith.constant 0 : i32
    return %c0_i32, %c0_i32_0 : i32, i32
  }
  func.func @transform_2(%arg0: i32) -> (i32, i32) {
    %c0_i32 = arith.constant 0 : i32
    %c0_i32_0 = arith.constant 0 : i32
    %c0_i32_1 = arith.constant 0 : i32
    return %c0_i32, %c0_i32_0 : i32, i32
  }
  func.func @transform_3(%arg0: i32) -> (i32, i32, i32) {
    %c0_i32 = arith.constant 0 : i32
    %c0_i32_0 = arith.constant 0 : i32
    %c0_i32_1 = arith.constant 0 : i32
    return %arg0, %c0_i32, %c0_i32_0 : i32, i32, i32
  }
  func.func @transform_4(%arg0: i32) -> (i32, i32, i32) {
    %c0_i32 = arith.constant 0 : i32
    %c0_i32_0 = arith.constant 0 : i32
    %c0_i32_1 = arith.constant 0 : i32
    return %arg0, %c0_i32, %c0_i32_0 : i32, i32, i32
  }
  func.func @transform_5(%arg0: i32) -> (i32, i32) {
    %c0_i32 = arith.constant 0 : i32
    %c0_i32_0 = arith.constant 0 : i32
    %c0_i32_1 = arith.constant 0 : i32
    return %c0_i32, %c0_i32_0 : i32, i32
  }
  func.func @transform_6(%arg0: i32) -> (i32, i32) {
    %c0_i32 = arith.constant 0 : i32
    %c0_i32_0 = arith.constant 0 : i32
    %c0_i32_1 = arith.constant 0 : i32
    return %c0_i32, %c0_i32_0 : i32, i32
  }
  func.func @transform_7(%arg0: i32) -> (i32, i32) {
    %c0_i32 = arith.constant 0 : i32
    %c0_i32_0 = arith.constant 0 : i32
    %c0_i32_1 = arith.constant 0 : i32
    return %c0_i32, %c0_i32_0 : i32, i32
  }
  func.func @transform_8(%arg0: i32) -> (i32, i32) {
    %c0_i32 = arith.constant 0 : i32
    %c0_i32_0 = arith.constant 0 : i32
    %c0_i32_1 = arith.constant 0 : i32
    return %c0_i32, %c0_i32_0 : i32, i32
  }
  func.func @transform_9(%arg0: i32) -> (i32, i32) {
    %c0_i32 = arith.constant 0 : i32
    %c0_i32_0 = arith.constant 0 : i32
    %c0_i32_1 = arith.constant 0 : i32
    return %c0_i32, %c0_i32_0 : i32, i32
  }
}

</mosaic_0001>

<bundles_post_ra>
// kernel: tpu_custom_call.1
= control target key start
LH: loop header
LB: loop body
LE: loop exit
PB: predicated region body
PF: predicated region fallthrough
CT: control target
= control target key end

     0   :  { %14 = vsyncpa [#allocation4], 0  ;;  %s2236_s0 = inlined_call_operand.vmem [shape: bf16[128,128], index: 0, kind: input, shape index: {}]   ;;  %s2237_s1 = inlined_call_operand.vmem [shape: f32[128,1], index: 1, kind: input, shape index: {}]   ;;  %s2238_s2 = inlined_call_operand.vmem [shape: bf16[128,128], index: 2, kind: input, shape index: {}]   ;;  %s2239_s3 = inlined_call_operand.hbm [shape: bf16[2,256,128], index: 3, kind: input, shape index: {}]   ;;  %s2240_s4 = inlined_call_operand.vmem [shape: f32[2,1,128], index: 4, kind: input, shape index: {}]   ;;  %s2241_s5 = inlined_call_operand.hbm [shape: bf16[128,128], index: 5, kind: input, shape index: {}]   ;;  %s2242_s6 = inlined_call_operand.vmem [shape: f32[1,128], index: 6, kind: input, shape index: {}]   ;;  %s2243_s7 = inlined_call_operand.vmem [shape: bf16[8,128], index: 7, kind: input, shape index: {}]   ;;  %s2244_s8 = inlined_call_operand.vmem [shape: f32[8,1], index: 8, kind: input, shape index: {}]   ;;  %s2245_s9 = inlined_call_operand.hbm [shape: f32[8,128], index: 9, kind: output, shape index: {}]  }
   0x1   :  { %16 = vsyncpa [#allocation4 + $0x1], 0 }
   0x2   :  { %17 = vsyncpa [#allocation7], 0 }
   0x3   :  { %18 = vsyncpa [#allocation5], 0  ;;  %s1868_s30 = smov 0   ;;  %s1870_s10 = smov 0  }
   0x4   :  { %s1872_s11 = smov 0   ;;  %s1874_s12 = smov 0  }
   0x5 LB: > { %s1887_s13 = sadd.s32 4294967295, %s1807_s12   ;;  %p107_p0 = scmp.ne.s32.totalorder %s1799_s10, %s1795_s30  ;;  %s1807_s12 = sphi %s1874_s12, %s2261_s12   ;;  %s1803_s11 = sphi %s1872_s11, %s2260_s11   ;;  %s1799_s10 = sphi %s1870_s10, %s2259_s10   ;;  %s1795_s30 = sphi %s1868_s30, %s2258_s30  }
   0x6   : > { %p2246_p1 = scmp.eq.s32.totalorder %s1887_s13, 0  ;;  %p1312_p2 = scmp.ge.s32.totalorder %s1807_s12, 1 }
   0x7   : > { %p249_p3 = scmp.lt.s32.totalorder %s1807_s12, 3  ;;  %s1809_s16 = smov [#allocation6]  }
   0x8   : > { %p1896_p5 = por %p2246_p1, %p107_p0  ;;  %s270_s17 = sshll.u32 %s1809_s16, 4  ;;  %s271_s17 = int_to_ptr.vmem [resolvable:$true] %s270_s17 }
   0x9   : > { %p1900_p6 = pnand %p1312_p2, %p249_p3  ;;  %s1913_s19 = sadd.s32 1, %s1807_s12  }
   0xa   : > { %s2249_s14 = scalar_select %p1896_p5, 1, 0 }
   0xb   : > { %s2250_s15 = scalar_select %p1900_p6, 1, 0 }
   0xc   : > { %p1585_p7 = pneg %p1900_p6  ;;  %s94_s20 = sadd.s32 1, %s1803_s11 }
   0xd   : > { %s91_s21 = ssub.s32 %s1807_s12, %s1913_s19  ;;  %s1681_s24 = scalar_lea.hbm %s2241_s5, 1024 }
   0xe   : > { %p1908_p8 = pnand %p1585_p7, %p2246_p1  ;;  %p1682_p9 = scmp.ne.s32.totalorder %s2241_s5, %s1681_s24 }
   0xf   : > { %p1688_p13 = scmp.lt.u32.totalorder %s1681_s24, %s2241_s5 }
  0x10   : > { %p1683_p10 = pneg %p1908_p8 }
  0x12   : > { %p1684_p11 = pnand %p1683_p10, %p1682_p9 }
  0x14   : > { %p1685_p12 = pneg %p1684_p11 }
  0x16   : > { %p1690_p0 = pnand %p1688_p13, %p1685_p12 }
  0x18   : > { %1693 = shalt.err (!%p1690_p0)
}
  0x19   : > { %s1694_s29 = scalar_lea.vmem %s271_s17, 1024  ;;  %p1702_p4 = scmp.lt.s32.totalorder %s271_s17, %s271_s17 }
  0x1a   : > { %p1695_p2 = scmp.ne.s32.totalorder %s271_s17, %s1694_s29  ;;  %p1703_p1 = scmp.lt.s32.totalorder %s1694_s29, %s1694_s29 }
  0x1c   : > { %p1697_p3 = pnand %p1695_p2, %p1683_p10  ;;  %p1704_p5 = por %p1703_p1, %p1702_p4 }
  0x1e   : > { %p1698_p7 = pneg %p1697_p3 }
  0x20   : > { %p1705_p6 = pnand %p1704_p5, %p1698_p7 }
  0x22   : > { %1708 = shalt.err (!%p1705_p6)
}
  0x23   : > { %s1810_s30 = smov 64   ;;  %s1811_s16 = smov 4  }
  0x24   : > { %1588 = dma.hbm_to_vmem [thread:$0]  (!%p1908_p8), %s2241_s5, 1024, %s271_s17, [#allocation7], %s1810_s30, %s1810_s30, %s1811_s16  }
  0x25   : > { %p92_p1 = scmp.eq.s32.totalorder %s91_s21, 0  ;;  %p101_p4 = scmp.ne.s32.totalorder %s1803_s11, %s1799_s10 }
  0x26   : > { %p102_p5 = scmp.eq.s32.totalorder %s1807_s12, 0  ;;  %p1594_p6 = scmp.lt.s32.totalorder %s1807_s12, 2 }
  0x27   : > { %s1942_s24 = scalar_select %p92_p1, %s1803_s11, %s94_s20  }
  0x28   : > { %p103_p9 = por %p102_p5, %p101_p4  ;;  %s293_s25 = sand.u32 1, %s1803_s11  }
  0x29   : > { %s1315_s26 = sshll.u32 %s293_s25, 7  ;;  %s1369_s27 = sshll.u32 %s1807_s12, 11 }
  0x2a   : > { %s1949_s18 = scalar_lea.hbm %s2239_s3, %s1369_s27  ;;  %s297_s17 = scalar_lea.vmem [#allocation3], %s1315_s26 }
  0x2b   : > { %s304_s21 = sshll.u32 %s297_s17, 4  ;;  %p1953_p8 = pnand %p1594_p6, %p103_p9  ;;  %s1951_s21 = int_to_ptr.vmem [resolvable:$true] %s304_s21 }
  0x2c   : > { %s1957_s12 = scalar_lea.sflag [#allocation4], %s293_s25  ;;  %s1709_s22 = scalar_lea.hbm %s1949_s18, 2048 }
  0x2d   : > { %p1710_p10 = scmp.ne.s32.totalorder %s1949_s18, %s1709_s22  ;;  %p1711_p11 = pneg %p1953_p8 }
  0x2e   : > { %s1714_s27 = scalar_lea.hbm %s2239_s3, 4096  ;;  %p1715_p0 = scmp.lt.u32.totalorder %s1949_s18, %s2239_s3 }
  0x2f   : > { %p1712_p12 = pnand %p1711_p11, %p1710_p10  ;;  %p1716_p2 = scmp.lt.u32.totalorder %s1714_s27, %s1709_s22 }
  0x30   : > { %p1718_p7 = scmp.lt.u32.totalorder %s1709_s22, %s1949_s18 }
  0x31   : > { %p1713_p13 = pneg %p1712_p12  ;;  %p1717_p3 = por %p1716_p2, %p1715_p0 }
  0x33   : > { %p1719_p1 = por %p1718_p7, %p1717_p3 }
  0x35   : > { %p1720_p4 = pnand %p1719_p1, %p1713_p13 }
  0x37   : > { %1723 = shalt.err (!%p1720_p4)
}
  0x38   : > { %s1724_s25 = scalar_lea.vmem %s1951_s21, 2048  ;;  %s1812_s17 = smov [#allocation3]  }
  0x39   : > { %p1725_p5 = scmp.ne.s32.totalorder %s1951_s21, %s1724_s25  ;;  %s1729_s23 = sshll.u32 %s1812_s17, 4  ;;  %s1730_s23 = int_to_ptr.vmem [resolvable:$false] %s1729_s23 }
  0x3a   : > { %s1731_s26 = scalar_lea.vmem %s1730_s23, 4096  ;;  %p1732_p10 = scmp.lt.s32.totalorder %s1951_s21, %s1730_s23 }
  0x3b   : > { %p1727_p6 = pnand %p1725_p5, %p1711_p11  ;;  %p1733_p12 = scmp.lt.s32.totalorder %s1731_s26, %s1724_s25 }
  0x3d   : > { %p1728_p9 = pneg %p1727_p6  ;;  %p1734_p0 = por %p1733_p12, %p1732_p10 }
  0x3f   : > { %p1735_p2 = pnand %p1734_p0, %p1728_p9 }
  0x41   : > { %1738 = shalt.err (!%p1735_p2)
}
  0x42   : > { %1592 = dma.hbm_to_vmem [thread:$0]  (!%p1953_p8), %s1949_s18, 2048, %s1951_s21, %s1957_s12, %s1810_s30, %s1810_s30, %s1811_s16  }
  0x43   : > { %p2253_p11 = scmp.ne.s32.totalorder %s2250_s15, 0 }
  0x44   : > { %s324_s22 = sand.u32 (!%p2253_p11), 1, %s1799_s10   ;;  %p2254_p13 = scmp.ne.s32.totalorder (!%p2253_p11), %s2249_s14, 0 }
  0x45   : > { %322 = sbr.rel (%p2253_p11) target bundleno = 1112 (0x458), region = 56  ;;  %s1319_s27 = sshll.u32 (!%p2253_p11), %s324_s22, 7 }
  0x46   : > { %s325_s28 = scalar_lea.sflag (!%p2253_p11), [#allocation4], %s324_s22  ;;  %s1991_s29 = scalar_lea.vmem (!%p2253_p11), [#allocation3], %s1319_s27 }
  0x4c   : > { %1782 = dma.done.wait (%p2254_p13), %s325_s28, 2048  }
  0x4d   : > { %1784 = vsyncadd (%p2254_p13), %s325_s28, 4294965248  ;;  %p2255_p3 = scmp.eq.s32.totalorder %s1887_s13, 0 }
  0x4f   : > { %1786 = dma.done.wait (%p2255_p3), [#allocation7], 1024   ;;  %p2256_p8 = pmov %p2255_p3 }
  0x50   : > { %p365_p7 = scmp.lt.s32.totalorder %s1887_s13, 1  ;;  %p2257_p1 = scmp.ne.s32.totalorder %s1887_s13, 0 }
  0x51   : > { %1788 = vsyncadd (%p2256_p8), [#allocation7], 4294966272  ;;  %v1638_v0 = vld [vmem:[%s2238_s2] sm:$0xff] (!%p2257_p1)   ;;  %v1639_v1 = vld [vmem:[%s2238_s2 + $0x8] sm:$0xff] (!%p2257_p1)  }
  0x52   : > { %s2003_s15 = scalar_select %p365_p7, %s1887_s13, 1 }
  0x53   : > { %372 = sbr.rel (%p2257_p1) target bundleno = 90 (0x5a), region = 68  ;;  %437 = vst [vmem:[#allocation2] sm:$0xff] (!%p2257_p1), %v1638_v0  ;;  %v1640_v2 = vld [vmem:[%s2238_s2 + $0x10] sm:$0xff] (!%p2257_p1)   ;;  %438 = vst [vmem:[#allocation2 + $0x8] sm:$0xff] (!%p2257_p1), %v1639_v1  ;;  %v1641_v3 = vld [vmem:[%s2238_s2 + $0x18] sm:$0xff] (!%p2257_p1)  }
  0x54   : > { %s367_s18 = scalar_lea.vmem %s2240_s4, %s2003_s15  ;;  %439 = vst [vmem:[#allocation2 + $0x10] sm:$0xff] (!%p2257_p1), %v1640_v2  ;;  %v1642_v4 = vld [vmem:[%s2238_s2 + $0x20] sm:$0xff] (!%p2257_p1)   ;;  %440 = vst [vmem:[#allocation2 + $0x18] sm:$0xff] (!%p2257_p1), %v1641_v3  ;;  %v1643_v5 = vld [vmem:[%s2238_s2 + $0x28] sm:$0xff] (!%p2257_p1)  }
  0x55   : > { %441 = vst [vmem:[#allocation2 + $0x20] sm:$0xff] (!%p2257_p1), %v1642_v4  ;;  %v1644_v6 = vld [vmem:[%s2238_s2 + $0x30] sm:$0xff] (!%p2257_p1)   ;;  %442 = vst [vmem:[#allocation2 + $0x28] sm:$0xff] (!%p2257_p1), %v1643_v5  ;;  %v1645_v7 = vld [vmem:[%s2238_s2 + $0x38] sm:$0xff] (!%p2257_p1)  }
  0x56   : > { %443 = vst [vmem:[#allocation2 + $0x30] sm:$0xff] (!%p2257_p1), %v1644_v6  ;;  %444 = vst [vmem:[#allocation2 + $0x38] sm:$0xff] (!%p2257_p1), %v1645_v7 }
  0x5a PF: > { %v2035_v8 = vld [vmem:[#allocation2] sm:$0xff]  ;;  %v2037_v9 = vld [vmem:[#allocation2 + $0x8] sm:$0xff]  ;;  %v1813_v10 = vmov 0   ;;  %v620_v15 = vld [vmem:[%s2237_s1 + $0x30] sm:$0xff]  ;;  %p1355_p4 = scmp.ne.s32.totalorder %s1887_s13, 1 }
  0x5b   : > { %1475 = vmatprep.subr.bf16.mxu0 %v2035_v8  ;;  %1646 = vset.pattern.permute.xlu0 %v1813_v10  ;;  %v447_v11 = vld [vmem:[#allocation2 + $0x10] sm:$0xff]  ;;  %v1648_v12 = vld [vmem:[%s2236_s0] sm:$0xff]   ;;  %v2046_v13 = vld [vmem:[#allocation2 + $0x18] sm:$0xff]  ;;  %vm1815_vm0 = vmmov (!%p1355_p4), 0  }
  0x5c   : > { %1476 = vmatpush3.bf16.msra.mxu0 %v2035_v8  ;;  %1647 = vset.pattern.permute.xlu1 %v1813_v10  ;;  %v618_v14 = vld [vmem:[%s2237_s1 + $0x20] sm:$0xff]  ;;  %v619_v17 = vld [vmem:[%s2237_s1 + $0x28] sm:$0xff]  ;;  %v621_v18 = vld [vmem:[%s2237_s1 + $0x38] sm:$0xff] }
  0x5d   : > { %1477 = vmatprep.subr.bf16.mxu0 %v2037_v9  ;;  %917 = vmatprep.mubr.bf16.mxu1 %v447_v11  ;;  %v2055_v16 = vld [vmem:[#allocation2 + $0x20] sm:$0xff]  ;;  %v2065_v19 = vld [vmem:[#allocation2 + $0x28] sm:$0xff]  ;;  %v2075_v23 = vld [vmem:[#allocation2 + $0x30] sm:$0xff] }
  0x5e   : > { %1491 = vmatprep.mubr.bf16.mxu0 %v1648_v12  ;;  %652 = vperm.xlu0 %1646, %v618_v14   ;;  %v622_v20 = vld [vmem:[%s2237_s1 + $0x40] sm:$0xff]  ;;  %v623_v22 = vld [vmem:[%s2237_s1 + $0x48] sm:$0xff]  ;;  %v624_v26 = vld [vmem:[%s2237_s1 + $0x50] sm:$0xff] }
  0x5f   : > { %662 = vperm.xlu1 %1647, %v620_v15   ;;  %v1656_v21 = vld [vmem:[%s1991_s29 + $0x40] sm:$0xff]   ;;  %v1658_v25 = vld [vmem:[%s1991_s29 + $0x48] sm:$0xff]   ;;  %v625_v27 = vld [vmem:[%s2237_s1 + $0x58] sm:$0xff] }
  0x60   : > { %1478 = vmatpush3.bf16.msra.mxu0 %v2037_v9  ;;  %v1657_v24 = vld [vmem:[%s1991_s29] sm:$0xff]   ;;  %1559 = vmatprep.subr.bf16.mxu1 %v1656_v21  ;;  %v2087_v28 = vld [vmem:[#allocation2 + $0x38] sm:$0xff]  ;;  %v1659_v30 = vld [vmem:[%s1991_s29 + $0x8] sm:$0xff]  }
  0x61   : > { %1479 = vmatprep.subr.bf16.mxu0 %v447_v11  ;;  %1567 = vmatpush3.bf16.msra.mxu1 %v1657_v24  ;;  %v614_v29 = vld [vmem:[%s2237_s1] sm:$0xff]  ;;  %v615_v31 = vld [vmem:[%s2237_s1 + $0x8] sm:$0xff]  ;;  %v1660_v32 = vld [vmem:[%s1991_s29 + $0x50] sm:$0xff]  }
  0x62   : > { %657 = vperm.xlu0 %1646, %v619_v17   ;;  %1560 = vmatprep.subr.bf16.mxu1 %v1658_v25  ;;  %v626_v33 = vld [vmem:[%s2237_s1 + $0x60] sm:$0xff]  ;;  %v1661_v34 = vld [vmem:[%s1991_s29 + $0x10] sm:$0xff]   ;;  %v1662_v35 = vld [vmem:[%s1991_s29 + $0x58] sm:$0xff]  }
  0x63   : > { %667 = vperm.xlu1 %1647, %v621_v18   ;;  %v1649_v36 = vld [vmem:[%s2236_s0 + $0x8] sm:$0xff]   ;;  %v1650_v38 = vld [vmem:[%s2236_s0 + $0x10] sm:$0xff]   ;;  %v1663_v39 = vld [vmem:[%s1991_s29 + $0x18] sm:$0xff]  }
  0x64   : > { %1480 = vmatpush3.bf16.msra.mxu0 %v447_v11  ;;  %v627_v37 = vld [vmem:[%s2237_s1 + $0x68] sm:$0xff]  ;;  %v1664_v40 = vld [vmem:[%s1991_s29 + $0x60] sm:$0xff]   ;;  %v616_v41 = vld [vmem:[%s2237_s1 + $0x10] sm:$0xff] }
  0x65   : > { %1481 = vmatprep.subr.bf16.mxu0 %v2046_v13  ;;  %1568 = vmatpush3.bf16.msra.mxu1 %v1659_v30  ;;  %v617_v42 = vld [vmem:[%s2237_s1 + $0x18] sm:$0xff]  ;;  %v1665_v43 = vld [vmem:[%s1991_s29 + $0x20] sm:$0xff]   ;;  %v1666_v44 = vld [vmem:[%s1991_s29 + $0x68] sm:$0xff]  }
  0x66   : > { %672 = vperm.xlu0 %1646, %v622_v20   ;;  %1561 = vmatprep.subr.bf16.mxu1 %v1660_v32  ;;  %v628_v45 = vld [vmem:[%s2237_s1 + $0x70] sm:$0xff]  ;;  %v1651_v46 = vld [vmem:[%s2236_s0 + $0x18] sm:$0xff]   ;;  %v1652_v48 = vld [vmem:[%s2236_s0 + $0x20] sm:$0xff]  }
  0x67   : > { %677 = vperm.xlu1 %1647, %v623_v22   ;;  %v629_v47 = vld [vmem:[%s2237_s1 + $0x78] sm:$0xff]  ;;  %v1667_v49 = vld [vmem:[%s1991_s29 + $0x28] sm:$0xff]   ;;  %v1654_v51 = vld [vmem:[%s2236_s0 + $0x30] sm:$0xff]  }
  0x68   : > { %1482 = vmatpush3.bf16.msra.mxu0 %v2046_v13  ;;  %v1653_v50 = vld [vmem:[%s2236_s0 + $0x28] sm:$0xff]   ;;  %v1655_v52 = vld [vmem:[%s2236_s0 + $0x38] sm:$0xff]   ;;  %v1668_v53 = vld [vmem:[%s1991_s29 + $0x70] sm:$0xff]  }
  0x69   : > { %1483 = vmatprep.subr.bf16.mxu0 %v2055_v16  ;;  %1569 = vmatpush3.bf16.msra.mxu1 %v1661_v34  ;;  %v1669_v54 = vld [vmem:[%s1991_s29 + $0x30] sm:$0xff]   ;;  %v1670_v55 = vld [vmem:[%s1991_s29 + $0x78] sm:$0xff]  }
  0x6a   : > { %682 = vperm.xlu0 %1646, %v624_v26   ;;  %1562 = vmatprep.subr.bf16.mxu1 %v1662_v35  ;;  %v1671_v56 = vld [vmem:[%s1991_s29 + $0x38] sm:$0xff]  }
  0x6b   : > { %687 = vperm.xlu1 %1647, %v625_v27  }
  0x6c   : > { %1484 = vmatpush3.bf16.msra.mxu0 %v2055_v16 }
  0x6d   : > { %1485 = vmatprep.subr.bf16.mxu0 %v2065_v19  ;;  %1570 = vmatpush3.bf16.msra.mxu1 %v1663_v39 }
  0x6e   : > { %632 = vperm.xlu0 %1646, %v614_v29   ;;  %1563 = vmatprep.subr.bf16.mxu1 %v1664_v40 }
  0x6f   : > { %637 = vperm.xlu1 %1647, %v615_v31  }
  0x70   : > { %1486 = vmatpush3.bf16.msra.mxu0 %v2065_v19 }
  0x71   : > { %1487 = vmatprep.subr.bf16.mxu0 %v2075_v23  ;;  %1571 = vmatpush3.bf16.msra.mxu1 %v1665_v43 }
  0x72   : > { %692 = vperm.xlu0 %1646, %v626_v33   ;;  %1564 = vmatprep.subr.bf16.mxu1 %v1666_v44 }
  0x73   : > { %697 = vperm.xlu1 %1647, %v627_v37  }
  0x74   : > { %1488 = vmatpush3.bf16.msra.mxu0 %v2075_v23 }
  0x75   : > { %1489 = vmatprep.subr.bf16.mxu0 %v2087_v28  ;;  %1572 = vmatpush3.bf16.msra.mxu1 %v1667_v49 }
  0x76   : > { %642 = vperm.xlu0 %1646, %v616_v41   ;;  %1565 = vmatprep.subr.bf16.mxu1 %v1668_v53 }
  0x77   : > { %647 = vperm.xlu1 %1647, %v617_v42  }
  0x78   : > { %1490 = vmatpush3.bf16.msra.mxu0 %v2087_v28 }
  0x79   : > { %1386 = vmatprep.subr.bf16.mxu0 %v1656_v21  ;;  %1573 = vmatpush3.bf16.msra.mxu1 %v1669_v54 }
  0x7a   : > { %702 = vperm.xlu0 %1646, %v628_v45   ;;  %1566 = vmatprep.subr.bf16.mxu1 %v1670_v55 }
  0x7b   : > { %1492 = vmatmul.mubr.bf16.vlgmr.msra.gmra.mrb[0].mxu0 %v1649_v36  ;;  %707 = vperm.xlu1 %1647, %v629_v47  }
  0x7c   : > { %1495 = vmatprep.mubr.bf16.mxu0 %v1650_v38  ;;  %1387 = vmatpush3.bf16.msra.mxu0 %v1657_v24 }
  0x7d   : > { %1388 = vmatprep.subr.bf16.mxu0 %v1658_v25  ;;  %1574 = vmatpush3.bf16.msra.mxu1 %v1671_v56 }
  0x80   : > { %1389 = vmatpush3.bf16.msra.mxu0 %v1659_v30 }
  0x81   : > { %1390 = vmatprep.subr.bf16.mxu0 %v1660_v32 }
  0x83   : > { %1496 = vmatmul.mubr.bf16.gmra.mrb[4].mxu0 %v1651_v46 }
  0x84   : > { %1499 = vmatprep.mubr.bf16.mxu0 %v1652_v48  ;;  %1391 = vmatpush3.bf16.msra.mxu0 %v1661_v34 }
  0x85   : > { %1392 = vmatprep.subr.bf16.mxu0 %v1662_v35 }
  0x88   : > { %1393 = vmatpush3.bf16.msra.mxu0 %v1663_v39 }
  0x89   : > { %1394 = vmatprep.subr.bf16.mxu0 %v1664_v40 }
  0x8b   : > { %1500 = vmatmul.mubr.bf16.gmra.mrb[8].mxu0 %v1653_v50 }
  0x8c   : > { %1503 = vmatprep.mubr.bf16.mxu0 %v1654_v51  ;;  %1395 = vmatpush3.bf16.msra.mxu0 %v1665_v43 }
  0x8d   : > { %1396 = vmatprep.subr.bf16.mxu0 %v1666_v44 }
  0x90   : > { %1397 = vmatpush3.bf16.msra.mxu0 %v1667_v49 }
  0x91   : > { %1398 = vmatprep.subr.bf16.mxu0 %v1668_v53 }
  0x93   : > { %1504 = vmatmul.mubr.bf16.gmra.mrb[12].mxu0 %v1655_v52 }
  0x94   : > { %901 = vmatprep.mubr.bf16.mxu0 %v2035_v8  ;;  %1399 = vmatpush3.bf16.msra.mxu0 %v1669_v54 }
  0x95   : > { %1400 = vmatprep.subr.bf16.mxu0 %v1670_v55 }
  0x98   : > { %1401 = vmatpush3.bf16.msra.mxu0 %v1671_v56  ;;  %v2163_v56 = vld [vmem:[%s367_s18] ss:$0 sm:$0xff] }
  0xdd   : > { %v653_v57 = vpop.permute.xlu0 %652 }
  0xde   : > { %v663_v58 = vpop.permute.xlu1 %662 }
  0xe1   : > { %v658_v59 = vpop.permute.xlu0 %657 }
  0xe2   : > { %v668_v60 = vpop.permute.xlu1 %667 }
  0xe5   : > { %v673_v61 = vpop.permute.xlu0 %672 }
  0xe6   : > { %v678_v62 = vpop.permute.xlu1 %677 }
  0xe9   : > { %v683_v63 = vpop.permute.xlu0 %682 }
  0xea   : > { %v688_v0 = vpop.permute.xlu1 %687 }
  0xed   : > { %v633_v1 = vpop.permute.xlu0 %632 }
  0xee   : > { %v638_v2 = vpop.permute.xlu1 %637 }
  0xf1   : > { %v693_v3 = vpop.permute.xlu0 %692 }
  0xf2   : > { %v698_v4 = vpop.permute.xlu1 %697 }
  0xf5   : > { %v643_v5 = vpop.permute.xlu0 %642 }
  0xf6   : > { %v648_v7 = vpop.permute.xlu1 %647 }
  0xf9   : > { %v703_v43 = vpop.permute.xlu0 %702 }
  0xfa   : > { %v708_v45 = vpop.permute.xlu1 %707 }
 0x14e   : > { %v1493_v6 = vpop.f32.mrb[0].mxu0 }
 0x14f   : > { %v551_v8 = vpop.f32.mrb[1].mxu0  ;;  %v712_v11 = vmul.f32 %v1493_v6, %v643_v5 }
 0x150   : > { %v1494_v10 = vpop.f32.mrb[2].mxu0  ;;  %v710_v15 = vmul.f32 %v633_v1, %v551_v8 }
 0x151   : > { %v713_v12 = vmul.f32 %v1494_v10, %v648_v7  ;;  %v554_v14 = vpop.f32.mrb[3].mxu0 }
 0x152   : > { %v711_v17 = vmul.f32 %v638_v2, %v554_v14 }
 0x153   : > { %v727_v18 = vpack.c.bf16 %v713_v12, %v712_v11 }
 0x154   : > { %v726_v20 = vpack.c.bf16 %v711_v17, %v710_v15 }
 0x156   : > { %v1497_v21 = vpop.f32.mrb[4].mxu0  ;;  %902 = vmatmul.mubr.bf16.vlgmr.msra.gmra.mrb[16].mxu0 %v726_v20 }
 0x157   : > { %v567_v22 = vpop.f32.mrb[5].mxu0  ;;  %909 = vmatprep.mubr.bf16.mxu0 %v2037_v9  ;;  %v716_v25 = vmul.f32 %v1497_v21, %v663_v58 }
 0x158   : > { %v1498_v24 = vpop.f32.mrb[6].mxu0  ;;  %v714_v29 = vmul.f32 %v653_v57, %v567_v22 }
 0x159   : > { %v717_v26 = vmul.f32 %v1498_v24, %v668_v60  ;;  %v570_v27 = vpop.f32.mrb[7].mxu0 }
 0x15a   : > { %v715_v30 = vmul.f32 %v658_v59, %v570_v27 }
 0x15b   : > { %v729_v31 = vpack.c.bf16 %v717_v26, %v716_v25 }
 0x15c   : > { %v728_v32 = vpack.c.bf16 %v715_v30, %v714_v29 }
 0x15e   : > { %v1501_v33 = vpop.f32.mrb[8].mxu0  ;;  %910 = vmatmul.mubr.bf16.gmra.mrb[20].mxu0 %v727_v18  ;;  %918 = vmatmul.mubr.bf16.vlgmr.msra.gmra.mrb[0].mxu1 %v728_v32 }
 0x15f   : > { %v583_v34 = vpop.f32.mrb[9].mxu0  ;;  %925 = vmatprep.mubr.bf16.mxu1 %v2046_v13  ;;  %v720_v36 = vmul.f32 %v1501_v33, %v683_v63 }
 0x160   : > { %v1502_v35 = vpop.f32.mrb[10].mxu0  ;;  %v718_v39 = vmul.f32 %v673_v61, %v583_v34 }
 0x161   : > { %v721_v37 = vmul.f32 %v1502_v35, %v688_v0  ;;  %v586_v38 = vpop.f32.mrb[11].mxu0 }
 0x162   : > { %v719_v9 = vmul.f32 %v678_v62, %v586_v38 }
 0x163   : > { %v731_v40 = vpack.c.bf16 %v721_v37, %v720_v36 }
 0x164   : > { %v730_v41 = vpack.c.bf16 %v719_v9, %v718_v39 }
 0x166   : > { %v1505_v42 = vpop.f32.mrb[12].mxu0  ;;  %926 = vmatmul.mubr.bf16.gmra.mrb[4].mxu1 %v729_v31 }
 0x167   : > { %v599_v44 = vpop.f32.mrb[13].mxu0  ;;  %933 = vmatprep.mubr.bf16.mxu1 %v2055_v16  ;;  %v724_v47 = vmul.f32 %v1505_v42, %v703_v43 }
 0x168   : > { %v1506_v46 = vpop.f32.mrb[14].mxu0  ;;  %v722_v13 = vmul.f32 %v693_v3, %v599_v44 }
 0x169   : > { %v725_v48 = vmul.f32 %v1506_v46, %v708_v45  ;;  %v602_v49 = vpop.f32.mrb[15].mxu0 }
 0x16a   : > { %v723_v50 = vmul.f32 %v698_v4, %v602_v49 }
 0x16b   : > { %v733_v51 = vpack.c.bf16 %v725_v48, %v724_v47 }
 0x16c   : > { %v732_v52 = vpack.c.bf16 %v723_v50, %v722_v13 }
 0x16e   : > { %934 = vmatmul.mubr.bf16.gmra.mrb[8].mxu1 %v730_v41 }
 0x16f   : > { %941 = vmatprep.mubr.bf16.mxu1 %v2065_v19 }
 0x176   : > { %942 = vmatmul.mubr.bf16.gmra.mrb[12].mxu1 %v731_v40 }
 0x177   : > { %949 = vmatprep.mubr.bf16.mxu1 %v2075_v23 }
 0x17e   : > { %950 = vmatmul.mubr.bf16.gmra.mrb[16].mxu1 %v732_v52 }
 0x17f   : > { %957 = vmatprep.mubr.bf16.mxu1 %v2087_v28 }
 0x186   : > { %958 = vmatmul.mubr.bf16.gmra.mrb[20].mxu1 %v733_v51 }
 0x229   : > { %v1402_v16 = vpop.f32.mrb[16].mxu0 }
 0x22a   : > { %v1403_v53 = vpop.f32.mrb[17].mxu0 }
 0x22b   : > { %v1404_v54 = vadd.f32 %v1403_v53, %v1402_v16  ;;  %v1405_v55 = vpop.f32.mrb[18].mxu0 }
 0x22c   : > { %v1406_v57 = vpop.f32.mrb[19].mxu0 }
 0x22d   : > { %v1407_v58 = vadd.f32 %v1406_v57, %v1405_v55  ;;  %v904_v19 = vadd.f32 %v1404_v54, %v2163_v56 }
 0x22f   : > { %v907_v23 = vadd.f32 %v1407_v58, %v2163_v56 }
 0x231   : > { %v966_v59 = vpack.c.bf16 %v907_v23, %v904_v19  ;;  %v1408_v60 = vpop.f32.mrb[20].mxu0  ;;  %v1414_v28 = vpop.f32.mrb[0].mxu1 }
 0x232   : > { %v1409_v61 = vpop.f32.mrb[21].mxu0  ;;  %v1415_v62 = vpop.f32.mrb[1].mxu1 }
 0x233   : > { %974 = vst [vmem:[#allocation2] sm:$0xff] %v966_v59  ;;  %v1410_v63 = vadd.f32 %v1409_v61, %v1408_v60  ;;  %v1416_v0 = vadd.f32 %v1415_v62, %v1414_v28  ;;  %v1411_v1 = vpop.f32.mrb[22].mxu0  ;;  %v1417_v2 = vpop.f32.mrb[2].mxu1  ;;  %v1673_v60 = vld [vmem:[#allocation6] sm:$0xff] (!%p1355_p4)   ;;  %v1674_v28 = vld [vmem:[#allocation6 + $0x8] sm:$0xff] (!%p1355_p4)   ;;  %v1675_v61 = vld [vmem:[#allocation6 + $0x10] sm:$0xff] (!%p1355_p4)  }
 0x234   : > { %v1412_v3 = vpop.f32.mrb[23].mxu0  ;;  %v1418_v4 = vpop.f32.mrb[3].mxu1  ;;  %1507 = vmatprep.subr.bf16.mxu0 (!%p1355_p4), %v1673_v60  ;;  %v1676_v62 = vld [vmem:[#allocation6 + $0x18] sm:$0xff] (!%p1355_p4)  }
 0x235   : > { %v1413_v5 = vadd.f32 %v1412_v3, %v1411_v1  ;;  %v1419_v6 = vadd.f32 %v1418_v4, %v1417_v2  ;;  %v912_v7 = vadd.f32 %v1410_v63, %v2163_v56  ;;  %v920_v8 = vadd.f32 %v1416_v0, %v2163_v56  ;;  %1508 = vmatpush3.bf16.msra.mxu0 (!%p1355_p4), %v1673_v60  ;;  %v1677_v0 = vld [vmem:[#allocation6 + $0x20] sm:$0xff] (!%p1355_p4)   ;;  %v1679_v1 = vld [vmem:[#allocation6 + $0x30] sm:$0xff] (!%p1355_p4)   ;;  %v1680_v2 = vld [vmem:[#allocation6 + $0x38] sm:$0xff] (!%p1355_p4)  }
 0x236   : > { %1509 = vmatprep.subr.bf16.mxu0 (!%p1355_p4), %v1674_v28 }
 0x237   : > { %v915_v10 = vadd.f32 %v1413_v5, %v2163_v56  ;;  %v923_v11 = vadd.f32 %v1419_v6, %v2163_v56 }
 0x239   : > { %v967_v12 = vpack.c.bf16 %v915_v10, %v912_v7  ;;  %v968_v14 = vpack.c.bf16 %v923_v11, %v920_v8  ;;  %v1420_v15 = vpop.f32.mrb[4].mxu1  ;;  %1510 = vmatpush3.bf16.msra.mxu0 (!%p1355_p4), %v1674_v28  ;;  %v1814_v11 = vmov (!%p1355_p4), 0.0  }
 0x23a   : > { %v1421_v17 = vpop.f32.mrb[5].mxu1  ;;  %1511 = vmatprep.subr.bf16.mxu0 (!%p1355_p4), %v1675_v61  ;;  %v986_v63 = vld [vmem:[#allocation2] sm:$0xff] (!%p1355_p4)  ;;  %1539 = vmatprep.subr.bf16.mxu1 (!%p1355_p4), %v1814_v11 }
 0x23b   : > { %975 = vst [vmem:[#allocation2 + $0x8] sm:$0xff] %v967_v12  ;;  %976 = vst [vmem:[#allocation2 + $0x10] sm:$0xff] %v968_v14  ;;  %v1422_v18 = vadd.f32 %v1421_v17, %v1420_v15  ;;  %v1423_v20 = vpop.f32.mrb[6].mxu1  ;;  %1523 = vmatprep.mubr.bf16.mxu0 (!%p1355_p4), %v986_v63  ;;  %1555 = vmatprep.mubr.msk.bf16.mxu1 (!%p1355_p4), %vm1815_vm0, %v1814_v11  ;;  %v1227_v12 = vld [vmem:[%s2244_s8] sm:$0xff] (!%p1355_p4)  ;;  %v1816_v14 = vmov (!%p1355_p4), 0  }
 0x23c   : > { %v1424_v21 = vpop.f32.mrb[7].mxu1  ;;  %1672 = vset.pattern.permute.xlu0 (!%p1355_p4), %v1816_v14  ;;  %v1356_v15 = vld [vmem:[%s2242_s6] ss:$0 sm:$0xff] (!%p1355_p4) }
 0x23d   : > { %v1425_v22 = vadd.f32 %v1424_v21, %v1423_v20  ;;  %v928_v24 = vadd.f32 %v1422_v18, %v2163_v56  ;;  %1512 = vmatpush3.bf16.msra.mxu0 (!%p1355_p4), %v1675_v61  ;;  %1230 = vperm.xlu0 (!%p1355_p4), %1672, %v1227_v12  }
 0x23e   : > { %1513 = vmatprep.subr.bf16.mxu0 (!%p1355_p4), %v1676_v62 }
 0x23f   : > { %v931_v25 = vadd.f32 %v1425_v22, %v2163_v56 }
 0x241   : > { %v969_v26 = vpack.c.bf16 %v931_v25, %v928_v24  ;;  %v1426_v27 = vpop.f32.mrb[8].mxu1  ;;  %1514 = vmatpush3.bf16.msra.mxu0 (!%p1355_p4), %v1676_v62 }
 0x242   : > { %v1427_v29 = vpop.f32.mrb[9].mxu1  ;;  %1515 = vmatprep.subr.bf16.mxu0 (!%p1355_p4), %v1677_v0  ;;  %v987_v3 = vld [vmem:[#allocation2 + $0x8] sm:$0xff] (!%p1355_p4)  ;;  %v988_v4 = vld [vmem:[#allocation2 + $0x10] sm:$0xff] (!%p1355_p4) }
 0x243   : > { %977 = vst [vmem:[#allocation2 + $0x18] sm:$0xff] %v969_v26  ;;  %v1428_v30 = vadd.f32 %v1427_v29, %v1426_v27  ;;  %v1429_v31 = vpop.f32.mrb[10].mxu1 }
 0x244   : > { %v1430_v32 = vpop.f32.mrb[11].mxu1 }
 0x245   : > { %v1431_v33 = vadd.f32 %v1430_v32, %v1429_v31  ;;  %v936_v34 = vadd.f32 %v1428_v30, %v2163_v56  ;;  %1516 = vmatpush3.bf16.msra.mxu0 (!%p1355_p4), %v1677_v0 }
 0x247   : > { %v939_v35 = vadd.f32 %v1431_v33, %v2163_v56 }
 0x249   : > { %v970_v36 = vpack.c.bf16 %v939_v35, %v936_v34  ;;  %v1432_v37 = vpop.f32.mrb[12].mxu1 }
 0x24a   : > { %v1433_v38 = vpop.f32.mrb[13].mxu1  ;;  %v989_v5 = vld [vmem:[#allocation2 + $0x18] sm:$0xff] (!%p1355_p4) }
 0x24b   : > { %978 = vst [vmem:[#allocation2 + $0x20] sm:$0xff] %v970_v36  ;;  %v1434_v39 = vadd.f32 %v1433_v38, %v1432_v37  ;;  %v1435_v9 = vpop.f32.mrb[14].mxu1 }
 0x24c   : > { %v1436_v40 = vpop.f32.mrb[15].mxu1 }
 0x24d   : > { %v1437_v41 = vadd.f32 %v1436_v40, %v1435_v9  ;;  %v944_v42 = vadd.f32 %v1434_v39, %v2163_v56 }
 0x24f   : > { %v947_v43 = vadd.f32 %v1437_v41, %v2163_v56 }
 0x251   : > { %v971_v44 = vpack.c.bf16 %v947_v43, %v944_v42  ;;  %v1438_v45 = vpop.f32.mrb[16].mxu1 }
 0x252   : > { %v1439_v46 = vpop.f32.mrb[17].mxu1  ;;  %v990_v6 = vld [vmem:[#allocation2 + $0x20] sm:$0xff] (!%p1355_p4) }
 0x253   : > { %979 = vst [vmem:[#allocation2 + $0x28] sm:$0xff] %v971_v44  ;;  %v1440_v47 = vadd.f32 %v1439_v46, %v1438_v45  ;;  %v1441_v48 = vpop.f32.mrb[18].mxu1 }
 0x254   : > { %v1442_v49 = vpop.f32.mrb[19].mxu1 }
 0x255   : > { %v1443_v13 = vadd.f32 %v1442_v49, %v1441_v48  ;;  %v952_v50 = vadd.f32 %v1440_v47, %v2163_v56 }
 0x257   : > { %v955_v51 = vadd.f32 %v1443_v13, %v2163_v56 }
 0x259   : > { %v972_v52 = vpack.c.bf16 %v955_v51, %v952_v50  ;;  %v1444_v16 = vpop.f32.mrb[20].mxu1 }
 0x25a   : > { %v1445_v53 = vpop.f32.mrb[21].mxu1  ;;  %v991_v7 = vld [vmem:[#allocation2 + $0x28] sm:$0xff] (!%p1355_p4) }
 0x25b   : > { %980 = vst [vmem:[#allocation2 + $0x30] sm:$0xff] %v972_v52  ;;  %v1446_v54 = vadd.f32 %v1445_v53, %v1444_v16  ;;  %v1447_v55 = vpop.f32.mrb[22].mxu1 }
 0x25c   : > { %v1448_v57 = vpop.f32.mrb[23].mxu1 }
 0x25d   : > { %v1449_v58 = vadd.f32 %v1448_v57, %v1447_v55  ;;  %v960_v19 = vadd.f32 %v1446_v54, %v2163_v56  ;;  %985 = sbr.rel (%p1355_p4) target bundleno = 1087 (0x43f), region = 72 }
 0x25f   : > { %v963_v23 = vadd.f32 %v1449_v58, %v2163_v56  ;;  %v1678_v56 = vld [vmem:[#allocation6 + $0x28] sm:$0xff] (!%p1355_p4)  }
 0x260   : > { %1517 = vmatprep.subr.bf16.mxu0 (!%p1355_p4), %v1678_v56 }
 0x261   : > { %v973_v59 = vpack.c.bf16 %v963_v23, %v960_v19  ;;  %1518 = vmatpush3.bf16.msra.mxu0 (!%p1355_p4), %v1678_v56 }
 0x262   : > { %1519 = vmatprep.subr.bf16.mxu0 (!%p1355_p4), %v1679_v1  ;;  %v992_v8 = vld [vmem:[#allocation2 + $0x30] sm:$0xff] (!%p1355_p4) }
 0x263   : > { %981 = vst [vmem:[#allocation2 + $0x38] sm:$0xff] %v973_v59 }
 0x265   : > { %1520 = vmatpush3.bf16.msra.mxu0 %v1679_v1 }
 0x266   : > { %1521 = vmatprep.subr.bf16.mxu0 %v1680_v2 }
 0x269   : > { %1522 = vmatpush3.bf16.msra.mxu0 %v1680_v2 }
 0x26a   : > { %v993_v10 = vld [vmem:[#allocation2 + $0x38] sm:$0xff] }
 0x26c   : > { %1524 = vmatmul.mubr.bf16.vlgmr.msra.gmra.mrb[0].mxu0 %v987_v3 }
 0x26d   : > { %1527 = vmatprep.mubr.bf16.mxu0 %v988_v4 }
 0x274   : > { %1528 = vmatmul.mubr.bf16.gmra.mrb[4].mxu0 %v989_v5 }
 0x275   : > { %1531 = vmatprep.mubr.bf16.mxu0 %v990_v6  ;;  %v1178_v6 = vld [vmem:[%s2243_s7] sm:$0xf] }
 0x27c   : > { %1532 = vmatmul.mubr.bf16.gmra.mrb[8].mxu0 %v991_v7 }
 0x27d   : > { %1535 = vmatprep.mubr.bf16.mxu0 %v992_v8 }
 0x284   : > { %1536 = vmatmul.mubr.bf16.gmra.mrb[12].mxu0 %v993_v10 }
 0x2bc   : > { %v1231_v7 = vpop.permute.xlu0 %1230 }
 0x33f   : > { %v1525_v17 = vpop.f32.mrb[0].mxu0 }
 0x340   : > { %v1108_v18 = vadd.f32 %v1525_v17, %v1356_v15  ;;  %v1099_v20 = vpop.f32.mrb[1].mxu0 }
 0x341   : > { %v1100_v21 = vadd.f32 %v1356_v15, %v1099_v20  ;;  %v1526_v22 = vpop.f32.mrb[2].mxu0 }
 0x342   : > { %v1111_v24 = vadd.f32 %v1526_v22, %v1356_v15  ;;  %v1102_v25 = vpop.f32.mrb[3].mxu0  ;;  %v1164_v27 = vmax.f32 %v1108_v18, 0.0 }
 0x343   : > { %v1103_v26 = vadd.f32 %v1356_v15, %v1102_v25  ;;  %v1162_v30 = vmax.f32 %v1100_v21, 0.0 }
 0x344   : > { %v1165_v29 = vmax.f32 %v1111_v24, 0.0 }
 0x345   : > { %v1163_v31 = vmax.f32 %v1103_v26, 0.0 }
 0x346   : > { %v1180_v32 = vpack.c.bf16 %v1165_v29, %v1164_v27 }
 0x347   : > { %v1529_v33 = vpop.f32.mrb[4].mxu0  ;;  %v1179_v34 = vpack.c.bf16 %v1163_v31, %v1162_v30 }
 0x348   : > { %v1124_v35 = vadd.f32 %v1529_v33, %v1356_v15  ;;  %v1115_v36 = vpop.f32.mrb[5].mxu0 }
 0x349   : > { %v1116_v37 = vadd.f32 %v1356_v15, %v1115_v36  ;;  %v1530_v38 = vpop.f32.mrb[6].mxu0  ;;  %1540 = vmatpush3.bf16.msra.mxu1 %v1179_v34 }
 0x34a   : > { %v1127_v39 = vadd.f32 %v1530_v38, %v1356_v15  ;;  %v1118_v9 = vpop.f32.mrb[7].mxu0  ;;  %1541 = vmatprep.subr.bf16.mxu1 %v1814_v11  ;;  %v1168_v41 = vmax.f32 %v1124_v35, 0.0 }
 0x34b   : > { %v1119_v40 = vadd.f32 %v1356_v15, %v1118_v9  ;;  %v1166_v43 = vmax.f32 %v1116_v37, 0.0 }
 0x34c   : > { %v1169_v42 = vmax.f32 %v1127_v39, 0.0 }
 0x34d   : > { %v1167_v44 = vmax.f32 %v1119_v40, 0.0  ;;  %1542 = vmatpush3.bf16.msra.mxu1 %v1180_v32 }
 0x34e   : > { %v1182_v45 = vpack.c.bf16 %v1169_v42, %v1168_v41  ;;  %1543 = vmatprep.subr.bf16.mxu1 %v1814_v11 }
 0x34f   : > { %v1181_v46 = vpack.c.bf16 %v1167_v44, %v1166_v43  ;;  %v1533_v47 = vpop.f32.mrb[8].mxu0 }
 0x350   : > { %v1140_v48 = vadd.f32 %v1533_v47, %v1356_v15  ;;  %v1131_v49 = vpop.f32.mrb[9].mxu0 }
 0x351   : > { %v1132_v13 = vadd.f32 %v1356_v15, %v1131_v49  ;;  %v1534_v50 = vpop.f32.mrb[10].mxu0  ;;  %1544 = vmatpush3.bf16.msra.mxu1 %v1181_v46 }
 0x352   : > { %v1143_v51 = vadd.f32 %v1534_v50, %v1356_v15  ;;  %v1134_v52 = vpop.f32.mrb[11].mxu0  ;;  %1545 = vmatprep.subr.bf16.mxu1 %v1814_v11  ;;  %v1172_v53 = vmax.f32 %v1140_v48, 0.0 }
 0x353   : > { %v1135_v16 = vadd.f32 %v1356_v15, %v1134_v52  ;;  %v1170_v55 = vmax.f32 %v1132_v13, 0.0 }
 0x354   : > { %v1173_v54 = vmax.f32 %v1143_v51, 0.0 }
 0x355   : > { %v1171_v57 = vmax.f32 %v1135_v16, 0.0  ;;  %1546 = vmatpush3.bf16.msra.mxu1 %v1182_v45 }
 0x356   : > { %v1184_v58 = vpack.c.bf16 %v1173_v54, %v1172_v53  ;;  %1547 = vmatprep.subr.bf16.mxu1 %v1814_v11 }
 0x357   : > { %v1183_v19 = vpack.c.bf16 %v1171_v57, %v1170_v55  ;;  %v1537_v23 = vpop.f32.mrb[12].mxu0 }
 0x358   : > { %v1156_v59 = vadd.f32 %v1537_v23, %v1356_v15  ;;  %v1147_v60 = vpop.f32.mrb[13].mxu0 }
 0x359   : > { %v1148_v28 = vadd.f32 %v1356_v15, %v1147_v60  ;;  %v1538_v61 = vpop.f32.mrb[14].mxu0  ;;  %1548 = vmatpush3.bf16.msra.mxu1 %v1183_v19 }
 0x35a   : > { %v1159_v62 = vadd.f32 %v1538_v61, %v1356_v15  ;;  %v1150_v63 = vpop.f32.mrb[15].mxu0  ;;  %1549 = vmatprep.subr.bf16.mxu1 %v1814_v11  ;;  %v1176_v56 = vmax.f32 %v1156_v59, 0.0 }
 0x35b   : > { %v1151_v0 = vadd.f32 %v1356_v15, %v1150_v63  ;;  %v1174_v2 = vmax.f32 %v1148_v28, 0.0 }
 0x35c   : > { %v1177_v1 = vmax.f32 %v1159_v62, 0.0 }
 0x35d   : > { %v1175_v3 = vmax.f32 %v1151_v0, 0.0  ;;  %1550 = vmatpush3.bf16.msra.mxu1 %v1184_v58 }
 0x35e   : > { %v1186_v4 = vpack.c.bf16 %v1177_v1, %v1176_v56  ;;  %1551 = vmatprep.subr.bf16.mxu1 %v1814_v11 }
 0x35f   : > { %v1185_v5 = vpack.c.bf16 %v1175_v3, %v1174_v2 }
 0x361   : > { %1552 = vmatpush3.bf16.msra.mxu1 %v1185_v5 }
 0x362   : > { %1553 = vmatprep.subr.bf16.mxu1 %v1814_v11 }
 0x365   : > { %1554 = vmatpush3.bf16.msra.mxu1 %v1186_v4 }
 0x368   : > { %1556 = vmatmul.mubr.bf16.vlgmr.msra.gmra.mrb[0].mxu1 %v1178_v6 }
 0x43b   : > { %v1221_v8 = vpop.f32.mrb[0].mxu1 }
 0x43c   : > { %v1233_v10 = vmul.f32 %v1231_v7, %v1221_v8  ;;  %v1557_v12 = vpop.f32.mrb[1].mxu1 }
 0x43d   : > { %v1224_v14 = vpop.f32.mrb[2].mxu1 }
 0x43e   : > { %1234 = vst [vmem:[#allocation8] sm:$0xff] %v1233_v10  ;;  %v1558_v15 = vpop.f32.mrb[3].mxu1 }
 0x43f PF: > { %p1596_p5 = scmp.eq.s32.totalorder %s1887_s13, 1  ;;  %s1817_s25 = smov [#allocation8]  }
 0x440   : > { %s1242_s17 = sshll.u32 %s1817_s25, 4  ;;  %s1243_s17 = int_to_ptr.vmem [resolvable:$true] %s1242_s17 }
 0x441   : > { %s1739_s23 = scalar_lea.vmem %s1243_s17, 128  ;;  %p1746_p12 = scmp.lt.s32.totalorder %s1243_s17, %s1243_s17 }
 0x442   : > { %p1740_p6 = scmp.ne.s32.totalorder %s1243_s17, %s1739_s23  ;;  %p1747_p0 = scmp.lt.s32.totalorder %s1739_s23, %s1739_s23 }
 0x444   : > { %p1741_p9 = pnand %p1740_p6, %p1596_p5  ;;  %p1748_p2 = por %p1747_p0, %p1746_p12 }
 0x446   : > { %p1742_p10 = pneg %p1741_p9 }
 0x448   : > { %p1749_p11 = pnand %p1748_p2, %p1742_p10 }
 0x44a   : > { %1752 = shalt.err (!%p1749_p11)
}
 0x44b   : > { %s1753_s27 = scalar_lea.hbm %s2245_s9, 128 }
 0x44c   : > { %p1754_p13 = scmp.ne.s32.totalorder %s2245_s9, %s1753_s27  ;;  %p1759_p7 = scmp.lt.u32.totalorder %s1753_s27, %s2245_s9 }
 0x44e   : > { %p1755_p3 = pnand %p1754_p13, %p1596_p5 }
 0x450   : > { %p1756_p8 = pneg %p1755_p3 }
 0x452   : > { %p1761_p1 = pnand %p1759_p7, %p1756_p8 }
 0x454   : > { %1764 = shalt.err (!%p1761_p1)
}
 0x455   : > { %1582 = dma.vmem_to_hbm [thread:$0]  (%p1596_p5), %s1243_s17, 128, %s2245_s9, [#allocation5]  }
 0x456   : > { %1790 = dma.done.wait (%p1596_p5), [#allocation5], 128  }
 0x457   : > { %1792 = vsyncadd (%p1596_p5), [#allocation5], 4294967168 }
 0x458 PF: > { %p21_p4 = scmp.ge.s32.totalorder %s1913_s19, 4   ;;  %s2258_s30 = smov %s1799_s10 }
 0x459   : > { %s2259_s10 = smov %s1803_s11  ;;  %s2260_s11 = smov %s1942_s24 }
 0x45a   : > { %s2261_s12 = smov %s1913_s19  ;;  %23 = sbr.rel (!%p21_p4) target bundleno = 5 (0x5), region = 108 }
 0x461   :  { %1255 = vsyncpa [#allocation4], 1 }
 0x462   :  { %1257 = vsyncpa [#allocation4 + $0x1], 1 }
 0x463   :  { %1258 = vsyncpa [#allocation7], 1 }
 0x464   :  { %1259 = vsyncpa [#allocation5], 1 }
 0x465   :  { %1261 = vsyncpa [#allocation5 + $0x1], 1 }

// kernel: tpu_custom_call.1
= control target key start
LH: loop header
LB: loop body
LE: loop exit
PB: predicated region body
PF: predicated region fallthrough
CT: control target
= control target key end

     0   :  { %14 = vsyncpa [#allocation4], 0  ;;  %s2236_s0 = inlined_call_operand.vmem [shape: bf16[128,128], index: 0, kind: input, shape index: {}]   ;;  %s2237_s1 = inlined_call_operand.vmem [shape: f32[128,1], index: 1, kind: input, shape index: {}]   ;;  %s2238_s2 = inlined_call_operand.vmem [shape: bf16[128,128], index: 2, kind: input, shape index: {}]   ;;  %s2239_s3 = inlined_call_operand.hbm [shape: bf16[2,256,128], index: 3, kind: input, shape index: {}]   ;;  %s2240_s4 = inlined_call_operand.vmem [shape: f32[2,1,128], index: 4, kind: input, shape index: {}]   ;;  %s2241_s5 = inlined_call_operand.hbm [shape: bf16[128,128], index: 5, kind: input, shape index: {}]   ;;  %s2242_s6 = inlined_call_operand.vmem [shape: f32[1,128], index: 6, kind: input, shape index: {}]   ;;  %s2243_s7 = inlined_call_operand.vmem [shape: bf16[8,128], index: 7, kind: input, shape index: {}]   ;;  %s2244_s8 = inlined_call_operand.vmem [shape: f32[8,1], index: 8, kind: input, shape index: {}]   ;;  %s2245_s9 = inlined_call_operand.hbm [shape: f32[8,128], index: 9, kind: output, shape index: {}]  }
   0x1   :  { %16 = vsyncpa [#allocation4 + $0x1], 0 }
   0x2   :  { %17 = vsyncpa [#allocation7], 0 }
   0x3   :  { %18 = vsyncpa [#allocation5], 0  ;;  %s1868_s30 = smov 0   ;;  %s1870_s10 = smov 0  }
   0x4   :  { %s1872_s11 = smov 0   ;;  %s1874_s12 = smov 0  }
   0x5 LB: > { %s1887_s13 = sadd.s32 4294967295, %s1807_s12   ;;  %p107_p0 = scmp.ne.s32.totalorder %s1799_s10, %s1795_s30  ;;  %s1807_s12 = sphi %s1874_s12, %s2261_s12   ;;  %s1803_s11 = sphi %s1872_s11, %s2260_s11   ;;  %s1799_s10 = sphi %s1870_s10, %s2259_s10   ;;  %s1795_s30 = sphi %s1868_s30, %s2258_s30  }
   0x6   : > { %p2246_p1 = scmp.eq.s32.totalorder %s1887_s13, 0  ;;  %p1312_p2 = scmp.ge.s32.totalorder %s1807_s12, 1 }
   0x7   : > { %p249_p3 = scmp.lt.s32.totalorder %s1807_s12, 3  ;;  %s1809_s16 = smov [#allocation6]  }
   0x8   : > { %p1896_p5 = por %p2246_p1, %p107_p0  ;;  %s270_s17 = sshll.u32 %s1809_s16, 4  ;;  %s271_s17 = int_to_ptr.vmem [resolvable:$true] %s270_s17 }
   0x9   : > { %p1900_p6 = pnand %p1312_p2, %p249_p3  ;;  %s1913_s19 = sadd.s32 1, %s1807_s12  }
   0xa   : > { %s2249_s14 = scalar_select %p1896_p5, 1, 0 }
   0xb   : > { %s2250_s15 = scalar_select %p1900_p6, 1, 0 }
   0xc   : > { %p1585_p7 = pneg %p1900_p6  ;;  %s94_s20 = sadd.s32 1, %s1803_s11 }
   0xd   : > { %s91_s21 = ssub.s32 %s1807_s12, %s1913_s19  ;;  %s1681_s24 = scalar_lea.hbm %s2241_s5, 1024 }
   0xe   : > { %p1908_p8 = pnand %p1585_p7, %p2246_p1  ;;  %p1682_p9 = scmp.ne.s32.totalorder %s2241_s5, %s1681_s24 }
   0xf   : > { %p1688_p13 = scmp.lt.u32.totalorder %s1681_s24, %s2241_s5 }
  0x10   : > { %p1683_p10 = pneg %p1908_p8 }
  0x12   : > { %p1684_p11 = pnand %p1683_p10, %p1682_p9 }
  0x14   : > { %p1685_p12 = pneg %p1684_p11 }
  0x16   : > { %p1690_p0 = pnand %p1688_p13, %p1685_p12 }
  0x18   : > { %1693 = shalt.err (!%p1690_p0)
}
  0x19   : > { %s1694_s29 = scalar_lea.vmem %s271_s17, 1024  ;;  %p1702_p4 = scmp.lt.s32.totalorder %s271_s17, %s271_s17 }
  0x1a   : > { %p1695_p2 = scmp.ne.s32.totalorder %s271_s17, %s1694_s29  ;;  %p1703_p1 = scmp.lt.s32.totalorder %s1694_s29, %s1694_s29 }
  0x1c   : > { %p1697_p3 = pnand %p1695_p2, %p1683_p10  ;;  %p1704_p5 = por %p1703_p1, %p1702_p4 }
  0x1e   : > { %p1698_p7 = pneg %p1697_p3 }
  0x20   : > { %p1705_p6 = pnand %p1704_p5, %p1698_p7 }
  0x22   : > { %1708 = shalt.err (!%p1705_p6)
}
  0x23   : > { %s1810_s30 = smov 64   ;;  %s1811_s16 = smov 4  }
  0x24   : > { %1588 = dma.hbm_to_vmem [thread:$0]  (!%p1908_p8), %s2241_s5, 1024, %s271_s17, [#allocation7], %s1810_s30, %s1810_s30, %s1811_s16  }
  0x25   : > { %p92_p1 = scmp.eq.s32.totalorder %s91_s21, 0  ;;  %p101_p4 = scmp.ne.s32.totalorder %s1803_s11, %s1799_s10 }
  0x26   : > { %p102_p5 = scmp.eq.s32.totalorder %s1807_s12, 0  ;;  %p1594_p6 = scmp.lt.s32.totalorder %s1807_s12, 2 }
  0x27   : > { %s1942_s24 = scalar_select %p92_p1, %s1803_s11, %s94_s20  }
  0x28   : > { %p103_p9 = por %p102_p5, %p101_p4  ;;  %s293_s25 = sand.u32 1, %s1803_s11  }
  0x29   : > { %s1315_s26 = sshll.u32 %s293_s25, 7  ;;  %s1369_s27 = sshll.u32 %s1807_s12, 11 }
  0x2a   : > { %s1949_s18 = scalar_lea.hbm %s2239_s3, %s1369_s27  ;;  %s297_s17 = scalar_lea.vmem [#allocation3], %s1315_s26 }
  0x2b   : > { %s304_s21 = sshll.u32 %s297_s17, 4  ;;  %p1953_p8 = pnand %p1594_p6, %p103_p9  ;;  %s1951_s21 = int_to_ptr.vmem [resolvable:$true] %s304_s21 }
  0x2c   : > { %s1957_s12 = scalar_lea.sflag [#allocation4], %s293_s25  ;;  %s1709_s22 = scalar_lea.hbm %s1949_s18, 2048 }
  0x2d   : > { %p1710_p10 = scmp.ne.s32.totalorder %s1949_s18, %s1709_s22  ;;  %p1711_p11 = pneg %p1953_p8 }
  0x2e   : > { %s1714_s27 = scalar_lea.hbm %s2239_s3, 4096  ;;  %p1715_p0 = scmp.lt.u32.totalorder %s1949_s18, %s2239_s3 }
  0x2f   : > { %p1712_p12 = pnand %p1711_p11, %p1710_p10  ;;  %p1716_p2 = scmp.lt.u32.totalorder %s1714_s27, %s1709_s22 }
  0x30   : > { %p1718_p7 = scmp.lt.u32.totalorder %s1709_s22, %s1949_s18 }
  0x31   : > { %p1713_p13 = pneg %p1712_p12  ;;  %p1717_p3 = por %p1716_p2, %p1715_p0 }
  0x33   : > { %p1719_p1 = por %p1718_p7, %p1717_p3 }
  0x35   : > { %p1720_p4 = pnand %p1719_p1, %p1713_p13 }
  0x37   : > { %1723 = shalt.err (!%p1720_p4)
}
  0x38   : > { %s1724_s25 = scalar_lea.vmem %s1951_s21, 2048  ;;  %s1812_s17 = smov [#allocation3]  }
  0x39   : > { %p1725_p5 = scmp.ne.s32.totalorder %s1951_s21, %s1724_s25  ;;  %s1729_s23 = sshll.u32 %s1812_s17, 4  ;;  %s1730_s23 = int_to_ptr.vmem [resolvable:$false] %s1729_s23 }
  0x3a   : > { %s1731_s26 = scalar_lea.vmem %s1730_s23, 4096  ;;  %p1732_p10 = scmp.lt.s32.totalorder %s1951_s21, %s1730_s23 }
  0x3b   : > { %p1727_p6 = pnand %p1725_p5, %p1711_p11  ;;  %p1733_p12 = scmp.lt.s32.totalorder %s1731_s26, %s1724_s25 }
  0x3d   : > { %p1728_p9 = pneg %p1727_p6  ;;  %p1734_p0 = por %p1733_p12, %p1732_p10 }
  0x3f   : > { %p1735_p2 = pnand %p1734_p0, %p1728_p9 }
  0x41   : > { %1738 = shalt.err (!%p1735_p2)
}
  0x42   : > { %1592 = dma.hbm_to_vmem [thread:$0]  (!%p1953_p8), %s1949_s18, 2048, %s1951_s21, %s1957_s12, %s1810_s30, %s1810_s30, %s1811_s16  }
  0x43   : > { %p2253_p11 = scmp.ne.s32.totalorder %s2250_s15, 0 }
  0x44   : > { %s324_s22 = sand.u32 (!%p2253_p11), 1, %s1799_s10   ;;  %p2254_p13 = scmp.ne.s32.totalorder (!%p2253_p11), %s2249_s14, 0 }
  0x45   : > { %322 = sbr.rel (%p2253_p11) target bundleno = 1112 (0x458), region = 56  ;;  %s1319_s27 = sshll.u32 (!%p2253_p11), %s324_s22, 7 }
  0x46   : > { %s325_s28 = scalar_lea.sflag (!%p2253_p11), [#allocation4], %s324_s22  ;;  %s1991_s29 = scalar_lea.vmem (!%p2253_p11), [#allocation3], %s1319_s27 }
  0x4c   : > { %1782 = dma.done.wait (%p2254_p13), %s325_s28, 2048  }
  0x4d   : > { %1784 = vsyncadd (%p2254_p13), %s325_s28, 4294965248  ;;  %p2255_p3 = scmp.eq.s32.totalorder %s1887_s13, 0 }
  0x4f   : > { %1786 = dma.done.wait (%p2255_p3), [#allocation7], 1024   ;;  %p2256_p8 = pmov %p2255_p3 }
  0x50   : > { %p365_p7 = scmp.lt.s32.totalorder %s1887_s13, 1  ;;  %p2257_p1 = scmp.ne.s32.totalorder %s1887_s13, 0 }
  0x51   : > { %1788 = vsyncadd (%p2256_p8), [#allocation7], 4294966272  ;;  %v1638_v0 = vld [vmem:[%s2238_s2] sm:$0xff] (!%p2257_p1)   ;;  %v1639_v1 = vld [vmem:[%s2238_s2 + $0x8] sm:$0xff] (!%p2257_p1)  }
  0x52   : > { %s2003_s15 = scalar_select %p365_p7, %s1887_s13, 1 }
  0x53   : > { %372 = sbr.rel (%p2257_p1) target bundleno = 90 (0x5a), region = 68  ;;  %437 = vst [vmem:[#allocation2] sm:$0xff] (!%p2257_p1), %v1638_v0  ;;  %v1640_v2 = vld [vmem:[%s2238_s2 + $0x10] sm:$0xff] (!%p2257_p1)   ;;  %438 = vst [vmem:[#allocation2 + $0x8] sm:$0xff] (!%p2257_p1), %v1639_v1  ;;  %v1641_v3 = vld [vmem:[%s2238_s2 + $0x18] sm:$0xff] (!%p2257_p1)  }
  0x54   : > { %s367_s18 = scalar_lea.vmem %s2240_s4, %s2003_s15  ;;  %439 = vst [vmem:[#allocation2 + $0x10] sm:$0xff] (!%p2257_p1), %v1640_v2  ;;  %v1642_v4 = vld [vmem:[%s2238_s2 + $0x20] sm:$0xff] (!%p2257_p1)   ;;  %440 = vst [vmem:[#allocation2 + $0x18] sm:$0xff] (!%p2257_p1), %v1641_v3  ;;  %v1643_v5 = vld [vmem:[%s2238_s2 + $0x28] sm:$0xff] (!%p2257_p1)  }
  0x55   : > { %441 = vst [vmem:[#allocation2 + $0x20] sm:$0xff] (!%p2257_p1), %v1642_v4  ;;  %v1644_v6 = vld [vmem:[%s2238_s2 + $0x30] sm:$0xff] (!%p2257_p1)   ;;  %442 = vst [vmem:[#allocation2 + $0x28] sm:$0xff] (!%p2257_p1), %v1643_v5  ;;  %v1645_v7 = vld [vmem:[%s2238_s2 + $0x38] sm:$0xff] (!%p2257_p1)  }
  0x56   : > { %443 = vst [vmem:[#allocation2 + $0x30] sm:$0xff] (!%p2257_p1), %v1644_v6  ;;  %444 = vst [vmem:[#allocation2 + $0x38] sm:$0xff] (!%p2257_p1), %v1645_v7 }
  0x5a PF: > { %v2035_v8 = vld [vmem:[#allocation2] sm:$0xff]  ;;  %v2037_v9 = vld [vmem:[#allocation2 + $0x8] sm:$0xff]  ;;  %v1813_v10 = vmov 0   ;;  %v620_v15 = vld [vmem:[%s2237_s1 + $0x30] sm:$0xff]  ;;  %p1355_p4 = scmp.ne.s32.totalorder %s1887_s13, 1 }
  0x5b   : > { %1475 = vmatprep.subr.bf16.mxu0 %v2035_v8  ;;  %1646 = vset.pattern.permute.xlu0 %v1813_v10  ;;  %v447_v11 = vld [vmem:[#allocation2 + $0x10] sm:$0xff]  ;;  %v1648_v12 = vld [vmem:[%s2236_s0] sm:$0xff]   ;;  %v2046_v13 = vld [vmem:[#allocation2 + $0x18] sm:$0xff]  ;;  %vm1815_vm0 = vmmov (!%p1355_p4), 0  }
  0x5c   : > { %1476 = vmatpush3.bf16.msra.mxu0 %v2035_v8  ;;  %1647 = vset.pattern.permute.xlu1 %v1813_v10  ;;  %v618_v14 = vld [vmem:[%s2237_s1 + $0x20] sm:$0xff]  ;;  %v619_v17 = vld [vmem:[%s2237_s1 + $0x28] sm:$0xff]  ;;  %v621_v18 = vld [vmem:[%s2237_s1 + $0x38] sm:$0xff] }
  0x5d   : > { %1477 = vmatprep.subr.bf16.mxu0 %v2037_v9  ;;  %917 = vmatprep.mubr.bf16.mxu1 %v447_v11  ;;  %v2055_v16 = vld [vmem:[#allocation2 + $0x20] sm:$0xff]  ;;  %v2065_v19 = vld [vmem:[#allocation2 + $0x28] sm:$0xff]  ;;  %v2075_v23 = vld [vmem:[#allocation2 + $0x30] sm:$0xff] }
  0x5e   : > { %1491 = vmatprep.mubr.bf16.mxu0 %v1648_v12  ;;  %652 = vperm.xlu0 %1646, %v618_v14   ;;  %v622_v20 = vld [vmem:[%s2237_s1 + $0x40] sm:$0xff]  ;;  %v623_v22 = vld [vmem:[%s2237_s1 + $0x48] sm:$0xff]  ;;  %v624_v26 = vld [vmem:[%s2237_s1 + $0x50] sm:$0xff] }
  0x5f   : > { %662 = vperm.xlu1 %1647, %v620_v15   ;;  %v1656_v21 = vld [vmem:[%s1991_s29 + $0x40] sm:$0xff]   ;;  %v1658_v25 = vld [vmem:[%s1991_s29 + $0x48] sm:$0xff]   ;;  %v625_v27 = vld [vmem:[%s2237_s1 + $0x58] sm:$0xff] }
  0x60   : > { %1478 = vmatpush3.bf16.msra.mxu0 %v2037_v9  ;;  %v1657_v24 = vld [vmem:[%s1991_s29] sm:$0xff]   ;;  %1559 = vmatprep.subr.bf16.mxu1 %v1656_v21  ;;  %v2087_v28 = vld [vmem:[#allocation2 + $0x38] sm:$0xff]  ;;  %v1659_v30 = vld [vmem:[%s1991_s29 + $0x8] sm:$0xff]  }
  0x61   : > { %1479 = vmatprep.subr.bf16.mxu0 %v447_v11  ;;  %1567 = vmatpush3.bf16.msra.mxu1 %v1657_v24  ;;  %v614_v29 = vld [vmem:[%s2237_s1] sm:$0xff]  ;;  %v615_v31 = vld [vmem:[%s2237_s1 + $0x8] sm:$0xff]  ;;  %v1660_v32 = vld [vmem:[%s1991_s29 + $0x50] sm:$0xff]  }
  0x62   : > { %657 = vperm.xlu0 %1646, %v619_v17   ;;  %1560 = vmatprep.subr.bf16.mxu1 %v1658_v25  ;;  %v626_v33 = vld [vmem:[%s2237_s1 + $0x60] sm:$0xff]  ;;  %v1661_v34 = vld [vmem:[%s1991_s29 + $0x10] sm:$0xff]   ;;  %v1662_v35 = vld [vmem:[%s1991_s29 + $0x58] sm:$0xff]  }
  0x63   : > { %667 = vperm.xlu1 %1647, %v621_v18   ;;  %v1649_v36 = vld [vmem:[%s2236_s0 + $0x8] sm:$0xff]   ;;  %v1650_v38 = vld [vmem:[%s2236_s0 + $0x10] sm:$0xff]   ;;  %v1663_v39 = vld [vmem:[%s1991_s29 + $0x18] sm:$0xff]  }
  0x64   : > { %1480 = vmatpush3.bf16.msra.mxu0 %v447_v11  ;;  %v627_v37 = vld [vmem:[%s2237_s1 + $0x68] sm:$0xff]  ;;  %v1664_v40 = vld [vmem:[%s1991_s29 + $0x60] sm:$0xff]   ;;  %v616_v41 = vld [vmem:[%s2237_s1 + $0x10] sm:$0xff] }
  0x65   : > { %1481 = vmatprep.subr.bf16.mxu0 %v2046_v13  ;;  %1568 = vmatpush3.bf16.msra.mxu1 %v1659_v30  ;;  %v617_v42 = vld [vmem:[%s2237_s1 + $0x18] sm:$0xff]  ;;  %v1665_v43 = vld [vmem:[%s1991_s29 + $0x20] sm:$0xff]   ;;  %v1666_v44 = vld [vmem:[%s1991_s29 + $0x68] sm:$0xff]  }
  0x66   : > { %672 = vperm.xlu0 %1646, %v622_v20   ;;  %1561 = vmatprep.subr.bf16.mxu1 %v1660_v32  ;;  %v628_v45 = vld [vmem:[%s2237_s1 + $0x70] sm:$0xff]  ;;  %v1651_v46 = vld [vmem:[%s2236_s0 + $0x18] sm:$0xff]   ;;  %v1652_v48 = vld [vmem:[%s2236_s0 + $0x20] sm:$0xff]  }
  0x67   : > { %677 = vperm.xlu1 %1647, %v623_v22   ;;  %v629_v47 = vld [vmem:[%s2237_s1 + $0x78] sm:$0xff]  ;;  %v1667_v49 = vld [vmem:[%s1991_s29 + $0x28] sm:$0xff]   ;;  %v1654_v51 = vld [vmem:[%s2236_s0 + $0x30] sm:$0xff]  }
  0x68   : > { %1482 = vmatpush3.bf16.msra.mxu0 %v2046_v13  ;;  %v1653_v50 = vld [vmem:[%s2236_s0 + $0x28] sm:$0xff]   ;;  %v1655_v52 = vld [vmem:[%s2236_s0 + $0x38] sm:$0xff]   ;;  %v1668_v53 = vld [vmem:[%s1991_s29 + $0x70] sm:$0xff]  }
  0x69   : > { %1483 = vmatprep.subr.bf16.mxu0 %v2055_v16  ;;  %1569 = vmatpush3.bf16.msra.mxu1 %v1661_v34  ;;  %v1669_v54 = vld [vmem:[%s1991_s29 + $0x30] sm:$0xff]   ;;  %v1670_v55 = vld [vmem:[%s1991_s29 + $0x78] sm:$0xff]  }
  0x6a   : > { %682 = vperm.xlu0 %1646, %v624_v26   ;;  %1562 = vmatprep.subr.bf16.mxu1 %v1662_v35  ;;  %v1671_v56 = vld [vmem:[%s1991_s29 + $0x38] sm:$0xff]  }
  0x6b   : > { %687 = vperm.xlu1 %1647, %v625_v27  }
  0x6c   : > { %1484 = vmatpush3.bf16.msra.mxu0 %v2055_v16 }
  0x6d   : > { %1485 = vmatprep.subr.bf16.mxu0 %v2065_v19  ;;  %1570 = vmatpush3.bf16.msra.mxu1 %v1663_v39 }
  0x6e   : > { %632 = vperm.xlu0 %1646, %v614_v29   ;;  %1563 = vmatprep.subr.bf16.mxu1 %v1664_v40 }
  0x6f   : > { %637 = vperm.xlu1 %1647, %v615_v31  }
  0x70   : > { %1486 = vmatpush3.bf16.msra.mxu0 %v2065_v19 }
  0x71   : > { %1487 = vmatprep.subr.bf16.mxu0 %v2075_v23  ;;  %1571 = vmatpush3.bf16.msra.mxu1 %v1665_v43 }
  0x72   : > { %692 = vperm.xlu0 %1646, %v626_v33   ;;  %1564 = vmatprep.subr.bf16.mxu1 %v1666_v44 }
  0x73   : > { %697 = vperm.xlu1 %1647, %v627_v37  }
  0x74   : > { %1488 = vmatpush3.bf16.msra.mxu0 %v2075_v23 }
  0x75   : > { %1489 = vmatprep.subr.bf16.mxu0 %v2087_v28  ;;  %1572 = vmatpush3.bf16.msra.mxu1 %v1667_v49 }
  0x76   : > { %642 = vperm.xlu0 %1646, %v616_v41   ;;  %1565 = vmatprep.subr.bf16.mxu1 %v1668_v53 }
  0x77   : > { %647 = vperm.xlu1 %1647, %v617_v42  }
  0x78   : > { %1490 = vmatpush3.bf16.msra.mxu0 %v2087_v28 }
  0x79   : > { %1386 = vmatprep.subr.bf16.mxu0 %v1656_v21  ;;  %1573 = vmatpush3.bf16.msra.mxu1 %v1669_v54 }
  0x7a   : > { %702 = vperm.xlu0 %1646, %v628_v45   ;;  %1566 = vmatprep.subr.bf16.mxu1 %v1670_v55 }
  0x7b   : > { %1492 = vmatmul.mubr.bf16.vlgmr.msra.gmra.mrb[0].mxu0 %v1649_v36  ;;  %707 = vperm.xlu1 %1647, %v629_v47  }
  0x7c   : > { %1495 = vmatprep.mubr.bf16.mxu0 %v1650_v38  ;;  %1387 = vmatpush3.bf16.msra.mxu0 %v1657_v24 }
  0x7d   : > { %1388 = vmatprep.subr.bf16.mxu0 %v1658_v25  ;;  %1574 = vmatpush3.bf16.msra.mxu1 %v1671_v56 }
  0x80   : > { %1389 = vmatpush3.bf16.msra.mxu0 %v1659_v30 }
  0x81   : > { %1390 = vmatprep.subr.bf16.mxu0 %v1660_v32 }
  0x83   : > { %1496 = vmatmul.mubr.bf16.gmra.mrb[4].mxu0 %v1651_v46 }
  0x84   : > { %1499 = vmatprep.mubr.bf16.mxu0 %v1652_v48  ;;  %1391 = vmatpush3.bf16.msra.mxu0 %v1661_v34 }
  0x85   : > { %1392 = vmatprep.subr.bf16.mxu0 %v1662_v35 }
  0x88   : > { %1393 = vmatpush3.bf16.msra.mxu0 %v1663_v39 }
  0x89   : > { %1394 = vmatprep.subr.bf16.mxu0 %v1664_v40 }
  0x8b   : > { %1500 = vmatmul.mubr.bf16.gmra.mrb[8].mxu0 %v1653_v50 }
  0x8c   : > { %1503 = vmatprep.mubr.bf16.mxu0 %v1654_v51  ;;  %1395 = vmatpush3.bf16.msra.mxu0 %v1665_v43 }
  0x8d   : > { %1396 = vmatprep.subr.bf16.mxu0 %v1666_v44 }
  0x90   : > { %1397 = vmatpush3.bf16.msra.mxu0 %v1667_v49 }
  0x91   : > { %1398 = vmatprep.subr.bf16.mxu0 %v1668_v53 }
  0x93   : > { %1504 = vmatmul.mubr.bf16.gmra.mrb[12].mxu0 %v1655_v52 }
  0x94   : > { %901 = vmatprep.mubr.bf16.mxu0 %v2035_v8  ;;  %1399 = vmatpush3.bf16.msra.mxu0 %v1669_v54 }
  0x95   : > { %1400 = vmatprep.subr.bf16.mxu0 %v1670_v55 }
  0x98   : > { %1401 = vmatpush3.bf16.msra.mxu0 %v1671_v56  ;;  %v2163_v56 = vld [vmem:[%s367_s18] ss:$0 sm:$0xff] }
  0xdd   : > { %v653_v57 = vpop.permute.xlu0 %652 }
  0xde   : > { %v663_v58 = vpop.permute.xlu1 %662 }
  0xe1   : > { %v658_v59 = vpop.permute.xlu0 %657 }
  0xe2   : > { %v668_v60 = vpop.permute.xlu1 %667 }
  0xe5   : > { %v673_v61 = vpop.permute.xlu0 %672 }
  0xe6   : > { %v678_v62 = vpop.permute.xlu1 %677 }
  0xe9   : > { %v683_v63 = vpop.permute.xlu0 %682 }
  0xea   : > { %v688_v0 = vpop.permute.xlu1 %687 }
  0xed   : > { %v633_v1 = vpop.permute.xlu0 %632 }
  0xee   : > { %v638_v2 = vpop.permute.xlu1 %637 }
  0xf1   : > { %v693_v3 = vpop.permute.xlu0 %692 }
  0xf2   : > { %v698_v4 = vpop.permute.xlu1 %697 }
  0xf5   : > { %v643_v5 = vpop.permute.xlu0 %642 }
  0xf6   : > { %v648_v7 = vpop.permute.xlu1 %647 }
  0xf9   : > { %v703_v43 = vpop.permute.xlu0 %702 }
  0xfa   : > { %v708_v45 = vpop.permute.xlu1 %707 }
 0x14e   : > { %v1493_v6 = vpop.f32.mrb[0].mxu0 }
 0x14f   : > { %v551_v8 = vpop.f32.mrb[1].mxu0  ;;  %v712_v11 = vmul.f32 %v1493_v6, %v643_v5 }
 0x150   : > { %v1494_v10 = vpop.f32.mrb[2].mxu0  ;;  %v710_v15 = vmul.f32 %v633_v1, %v551_v8 }
 0x151   : > { %v713_v12 = vmul.f32 %v1494_v10, %v648_v7  ;;  %v554_v14 = vpop.f32.mrb[3].mxu0 }
 0x152   : > { %v711_v17 = vmul.f32 %v638_v2, %v554_v14 }
 0x153   : > { %v727_v18 = vpack.c.bf16 %v713_v12, %v712_v11 }
 0x154   : > { %v726_v20 = vpack.c.bf16 %v711_v17, %v710_v15 }
 0x156   : > { %v1497_v21 = vpop.f32.mrb[4].mxu0  ;;  %902 = vmatmul.mubr.bf16.vlgmr.msra.gmra.mrb[16].mxu0 %v726_v20 }
 0x157   : > { %v567_v22 = vpop.f32.mrb[5].mxu0  ;;  %909 = vmatprep.mubr.bf16.mxu0 %v2037_v9  ;;  %v716_v25 = vmul.f32 %v1497_v21, %v663_v58 }
 0x158   : > { %v1498_v24 = vpop.f32.mrb[6].mxu0  ;;  %v714_v29 = vmul.f32 %v653_v57, %v567_v22 }
 0x159   : > { %v717_v26 = vmul.f32 %v1498_v24, %v668_v60  ;;  %v570_v27 = vpop.f32.mrb[7].mxu0 }
 0x15a   : > { %v715_v30 = vmul.f32 %v658_v59, %v570_v27 }
 0x15b   : > { %v729_v31 = vpack.c.bf16 %v717_v26, %v716_v25 }
 0x15c   : > { %v728_v32 = vpack.c.bf16 %v715_v30, %v714_v29 }
 0x15e   : > { %v1501_v33 = vpop.f32.mrb[8].mxu0  ;;  %910 = vmatmul.mubr.bf16.gmra.mrb[20].mxu0 %v727_v18  ;;  %918 = vmatmul.mubr.bf16.vlgmr.msra.gmra.mrb[0].mxu1 %v728_v32 }
 0x15f   : > { %v583_v34 = vpop.f32.mrb[9].mxu0  ;;  %925 = vmatprep.mubr.bf16.mxu1 %v2046_v13  ;;  %v720_v36 = vmul.f32 %v1501_v33, %v683_v63 }
 0x160   : > { %v1502_v35 = vpop.f32.mrb[10].mxu0  ;;  %v718_v39 = vmul.f32 %v673_v61, %v583_v34 }
 0x161   : > { %v721_v37 = vmul.f32 %v1502_v35, %v688_v0  ;;  %v586_v38 = vpop.f32.mrb[11].mxu0 }
 0x162   : > { %v719_v9 = vmul.f32 %v678_v62, %v586_v38 }
 0x163   : > { %v731_v40 = vpack.c.bf16 %v721_v37, %v720_v36 }
 0x164   : > { %v730_v41 = vpack.c.bf16 %v719_v9, %v718_v39 }
 0x166   : > { %v1505_v42 = vpop.f32.mrb[12].mxu0  ;;  %926 = vmatmul.mubr.bf16.gmra.mrb[4].mxu1 %v729_v31 }
 0x167   : > { %v599_v44 = vpop.f32.mrb[13].mxu0  ;;  %933 = vmatprep.mubr.bf16.mxu1 %v2055_v16  ;;  %v724_v47 = vmul.f32 %v1505_v42, %v703_v43 }
 0x168   : > { %v1506_v46 = vpop.f32.mrb[14].mxu0  ;;  %v722_v13 = vmul.f32 %v693_v3, %v599_v44 }
 0x169   : > { %v725_v48 = vmul.f32 %v1506_v46, %v708_v45  ;;  %v602_v49 = vpop.f32.mrb[15].mxu0 }
 0x16a   : > { %v723_v50 = vmul.f32 %v698_v4, %v602_v49 }
 0x16b   : > { %v733_v51 = vpack.c.bf16 %v725_v48, %v724_v47 }
 0x16c   : > { %v732_v52 = vpack.c.bf16 %v723_v50, %v722_v13 }
 0x16e   : > { %934 = vmatmul.mubr.bf16.gmra.mrb[8].mxu1 %v730_v41 }
 0x16f   : > { %941 = vmatprep.mubr.bf16.mxu1 %v2065_v19 }
 0x176   : > { %942 = vmatmul.mubr.bf16.gmra.mrb[12].mxu1 %v731_v40 }
 0x177   : > { %949 = vmatprep.mubr.bf16.mxu1 %v2075_v23 }
 0x17e   : > { %950 = vmatmul.mubr.bf16.gmra.mrb[16].mxu1 %v732_v52 }
 0x17f   : > { %957 = vmatprep.mubr.bf16.mxu1 %v2087_v28 }
 0x186   : > { %958 = vmatmul.mubr.bf16.gmra.mrb[20].mxu1 %v733_v51 }
 0x229   : > { %v1402_v16 = vpop.f32.mrb[16].mxu0 }
 0x22a   : > { %v1403_v53 = vpop.f32.mrb[17].mxu0 }
 0x22b   : > { %v1404_v54 = vadd.f32 %v1403_v53, %v1402_v16  ;;  %v1405_v55 = vpop.f32.mrb[18].mxu0 }
 0x22c   : > { %v1406_v57 = vpop.f32.mrb[19].mxu0 }
 0x22d   : > { %v1407_v58 = vadd.f32 %v1406_v57, %v1405_v55  ;;  %v904_v19 = vadd.f32 %v1404_v54, %v2163_v56 }
 0x22f   : > { %v907_v23 = vadd.f32 %v1407_v58, %v2163_v56 }
 0x231   : > { %v966_v59 = vpack.c.bf16 %v907_v23, %v904_v19  ;;  %v1408_v60 = vpop.f32.mrb[20].mxu0  ;;  %v1414_v28 = vpop.f32.mrb[0].mxu1 }
 0x232   : > { %v1409_v61 = vpop.f32.mrb[21].mxu0  ;;  %v1415_v62 = vpop.f32.mrb[1].mxu1 }
 0x233   : > { %974 = vst [vmem:[#allocation2] sm:$0xff] %v966_v59  ;;  %v1410_v63 = vadd.f32 %v1409_v61, %v1408_v60  ;;  %v1416_v0 = vadd.f32 %v1415_v62, %v1414_v28  ;;  %v1411_v1 = vpop.f32.mrb[22].mxu0  ;;  %v1417_v2 = vpop.f32.mrb[2].mxu1  ;;  %v1673_v60 = vld [vmem:[#allocation6] sm:$0xff] (!%p1355_p4)   ;;  %v1674_v28 = vld [vmem:[#allocation6 + $0x8] sm:$0xff] (!%p1355_p4)   ;;  %v1675_v61 = vld [vmem:[#allocation6 + $0x10] sm:$0xff] (!%p1355_p4)  }
 0x234   : > { %v1412_v3 = vpop.f32.mrb[23].mxu0  ;;  %v1418_v4 = vpop.f32.mrb[3].mxu1  ;;  %1507 = vmatprep.subr.bf16.mxu0 (!%p1355_p4), %v1673_v60  ;;  %v1676_v62 = vld [vmem:[#allocation6 + $0x18] sm:$0xff] (!%p1355_p4)  }
 0x235   : > { %v1413_v5 = vadd.f32 %v1412_v3, %v1411_v1  ;;  %v1419_v6 = vadd.f32 %v1418_v4, %v1417_v2  ;;  %v912_v7 = vadd.f32 %v1410_v63, %v2163_v56  ;;  %v920_v8 = vadd.f32 %v1416_v0, %v2163_v56  ;;  %1508 = vmatpush3.bf16.msra.mxu0 (!%p1355_p4), %v1673_v60  ;;  %v1677_v0 = vld [vmem:[#allocation6 + $0x20] sm:$0xff] (!%p1355_p4)   ;;  %v1679_v1 = vld [vmem:[#allocation6 + $0x30] sm:$0xff] (!%p1355_p4)   ;;  %v1680_v2 = vld [vmem:[#allocation6 + $0x38] sm:$0xff] (!%p1355_p4)  }
 0x236   : > { %1509 = vmatprep.subr.bf16.mxu0 (!%p1355_p4), %v1674_v28 }
 0x237   : > { %v915_v10 = vadd.f32 %v1413_v5, %v2163_v56  ;;  %v923_v11 = vadd.f32 %v1419_v6, %v2163_v56 }
 0x239   : > { %v967_v12 = vpack.c.bf16 %v915_v10, %v912_v7  ;;  %v968_v14 = vpack.c.bf16 %v923_v11, %v920_v8  ;;  %v1420_v15 = vpop.f32.mrb[4].mxu1  ;;  %1510 = vmatpush3.bf16.msra.mxu0 (!%p1355_p4), %v1674_v28  ;;  %v1814_v11 = vmov (!%p1355_p4), 0.0  }
 0x23a   : > { %v1421_v17 = vpop.f32.mrb[5].mxu1  ;;  %1511 = vmatprep.subr.bf16.mxu0 (!%p1355_p4), %v1675_v61  ;;  %v986_v63 = vld [vmem:[#allocation2] sm:$0xff] (!%p1355_p4)  ;;  %1539 = vmatprep.subr.bf16.mxu1 (!%p1355_p4), %v1814_v11 }
 0x23b   : > { %975 = vst [vmem:[#allocation2 + $0x8] sm:$0xff] %v967_v12  ;;  %976 = vst [vmem:[#allocation2 + $0x10] sm:$0xff] %v968_v14  ;;  %v1422_v18 = vadd.f32 %v1421_v17, %v1420_v15  ;;  %v1423_v20 = vpop.f32.mrb[6].mxu1  ;;  %1523 = vmatprep.mubr.bf16.mxu0 (!%p1355_p4), %v986_v63  ;;  %1555 = vmatprep.mubr.msk.bf16.mxu1 (!%p1355_p4), %vm1815_vm0, %v1814_v11  ;;  %v1227_v12 = vld [vmem:[%s2244_s8] sm:$0xff] (!%p1355_p4)  ;;  %v1816_v14 = vmov (!%p1355_p4), 0  }
 0x23c   : > { %v1424_v21 = vpop.f32.mrb[7].mxu1  ;;  %1672 = vset.pattern.permute.xlu0 (!%p1355_p4), %v1816_v14  ;;  %v1356_v15 = vld [vmem:[%s2242_s6] ss:$0 sm:$0xff] (!%p1355_p4) }
 0x23d   : > { %v1425_v22 = vadd.f32 %v1424_v21, %v1423_v20  ;;  %v928_v24 = vadd.f32 %v1422_v18, %v2163_v56  ;;  %1512 = vmatpush3.bf16.msra.mxu0 (!%p1355_p4), %v1675_v61  ;;  %1230 = vperm.xlu0 (!%p1355_p4), %1672, %v1227_v12  }
 0x23e   : > { %1513 = vmatprep.subr.bf16.mxu0 (!%p1355_p4), %v1676_v62 }
 0x23f   : > { %v931_v25 = vadd.f32 %v1425_v22, %v2163_v56 }
 0x241   : > { %v969_v26 = vpack.c.bf16 %v931_v25, %v928_v24  ;;  %v1426_v27 = vpop.f32.mrb[8].mxu1  ;;  %1514 = vmatpush3.bf16.msra.mxu0 (!%p1355_p4), %v1676_v62 }
 0x242   : > { %v1427_v29 = vpop.f32.mrb[9].mxu1  ;;  %1515 = vmatprep.subr.bf16.mxu0 (!%p1355_p4), %v1677_v0  ;;  %v987_v3 = vld [vmem:[#allocation2 + $0x8] sm:$0xff] (!%p1355_p4)  ;;  %v988_v4 = vld [vmem:[#allocation2 + $0x10] sm:$0xff] (!%p1355_p4) }
 0x243   : > { %977 = vst [vmem:[#allocation2 + $0x18] sm:$0xff] %v969_v26  ;;  %v1428_v30 = vadd.f32 %v1427_v29, %v1426_v27  ;;  %v1429_v31 = vpop.f32.mrb[10].mxu1 }
 0x244   : > { %v1430_v32 = vpop.f32.mrb[11].mxu1 }
 0x245   : > { %v1431_v33 = vadd.f32 %v1430_v32, %v1429_v31  ;;  %v936_v34 = vadd.f32 %v1428_v30, %v2163_v56  ;;  %1516 = vmatpush3.bf16.msra.mxu0 (!%p1355_p4), %v1677_v0 }
 0x247   : > { %v939_v35 = vadd.f32 %v1431_v33, %v2163_v56 }
 0x249   : > { %v970_v36 = vpack.c.bf16 %v939_v35, %v936_v34  ;;  %v1432_v37 = vpop.f32.mrb[12].mxu1 }
 0x24a   : > { %v1433_v38 = vpop.f32.mrb[13].mxu1  ;;  %v989_v5 = vld [vmem:[#allocation2 + $0x18] sm:$0xff] (!%p1355_p4) }
 0x24b   : > { %978 = vst [vmem:[#allocation2 + $0x20] sm:$0xff] %v970_v36  ;;  %v1434_v39 = vadd.f32 %v1433_v38, %v1432_v37  ;;  %v1435_v9 = vpop.f32.mrb[14].mxu1 }
 0x24c   : > { %v1436_v40 = vpop.f32.mrb[15].mxu1 }
 0x24d   : > { %v1437_v41 = vadd.f32 %v1436_v40, %v1435_v9  ;;  %v944_v42 = vadd.f32 %v1434_v39, %v2163_v56 }
 0x24f   : > { %v947_v43 = vadd.f32 %v1437_v41, %v2163_v56 }
 0x251   : > { %v971_v44 = vpack.c.bf16 %v947_v43, %v944_v42  ;;  %v1438_v45 = vpop.f32.mrb[16].mxu1 }
 0x252   : > { %v1439_v46 = vpop.f32.mrb[17].mxu1  ;;  %v990_v6 = vld [vmem:[#allocation2 + $0x20] sm:$0xff] (!%p1355_p4) }
 0x253   : > { %979 = vst [vmem:[#allocation2 + $0x28] sm:$0xff] %v971_v44  ;;  %v1440_v47 = vadd.f32 %v1439_v46, %v1438_v45  ;;  %v1441_v48 = vpop.f32.mrb[18].mxu1 }
 0x254   : > { %v1442_v49 = vpop.f32.mrb[19].mxu1 }
 0x255   : > { %v1443_v13 = vadd.f32 %v1442_v49, %v1441_v48  ;;  %v952_v50 = vadd.f32 %v1440_v47, %v2163_v56 }
 0x257   : > { %v955_v51 = vadd.f32 %v1443_v13, %v2163_v56 }
 0x259   : > { %v972_v52 = vpack.c.bf16 %v955_v51, %v952_v50  ;;  %v1444_v16 = vpop.f32.mrb[20].mxu1 }
 0x25a   : > { %v1445_v53 = vpop.f32.mrb[21].mxu1  ;;  %v991_v7 = vld [vmem:[#allocation2 + $0x28] sm:$0xff] (!%p1355_p4) }
 0x25b   : > { %980 = vst [vmem:[#allocation2 + $0x30] sm:$0xff] %v972_v52  ;;  %v1446_v54 = vadd.f32 %v1445_v53, %v1444_v16  ;;  %v1447_v55 = vpop.f32.mrb[22].mxu1 }
 0x25c   : > { %v1448_v57 = vpop.f32.mrb[23].mxu1 }
 0x25d   : > { %v1449_v58 = vadd.f32 %v1448_v57, %v1447_v55  ;;  %v960_v19 = vadd.f32 %v1446_v54, %v2163_v56  ;;  %985 = sbr.rel (%p1355_p4) target bundleno = 1087 (0x43f), region = 72 }
 0x25f   : > { %v963_v23 = vadd.f32 %v1449_v58, %v2163_v56  ;;  %v1678_v56 = vld [vmem:[#allocation6 + $0x28] sm:$0xff] (!%p1355_p4)  }
 0x260   : > { %1517 = vmatprep.subr.bf16.mxu0 (!%p1355_p4), %v1678_v56 }
 0x261   : > { %v973_v59 = vpack.c.bf16 %v963_v23, %v960_v19  ;;  %1518 = vmatpush3.bf16.msra.mxu0 (!%p1355_p4), %v1678_v56 }
 0x262   : > { %1519 = vmatprep.subr.bf16.mxu0 (!%p1355_p4), %v1679_v1  ;;  %v992_v8 = vld [vmem:[#allocation2 + $0x30] sm:$0xff] (!%p1355_p4) }
 0x263   : > { %981 = vst [vmem:[#allocation2 + $0x38] sm:$0xff] %v973_v59 }
 0x265   : > { %1520 = vmatpush3.bf16.msra.mxu0 %v1679_v1 }
 0x266   : > { %1521 = vmatprep.subr.bf16.mxu0 %v1680_v2 }
 0x269   : > { %1522 = vmatpush3.bf16.msra.mxu0 %v1680_v2 }
 0x26a   : > { %v993_v10 = vld [vmem:[#allocation2 + $0x38] sm:$0xff] }
 0x26c   : > { %1524 = vmatmul.mubr.bf16.vlgmr.msra.gmra.mrb[0].mxu0 %v987_v3 }
 0x26d   : > { %1527 = vmatprep.mubr.bf16.mxu0 %v988_v4 }
 0x274   : > { %1528 = vmatmul.mubr.bf16.gmra.mrb[4].mxu0 %v989_v5 }
 0x275   : > { %1531 = vmatprep.mubr.bf16.mxu0 %v990_v6  ;;  %v1178_v6 = vld [vmem:[%s2243_s7] sm:$0xf] }
 0x27c   : > { %1532 = vmatmul.mubr.bf16.gmra.mrb[8].mxu0 %v991_v7 }
 0x27d   : > { %1535 = vmatprep.mubr.bf16.mxu0 %v992_v8 }
 0x284   : > { %1536 = vmatmul.mubr.bf16.gmra.mrb[12].mxu0 %v993_v10 }
 0x2bc   : > { %v1231_v7 = vpop.permute.xlu0 %1230 }
 0x33f   : > { %v1525_v17 = vpop.f32.mrb[0].mxu0 }
 0x340   : > { %v1108_v18 = vadd.f32 %v1525_v17, %v1356_v15  ;;  %v1099_v20 = vpop.f32.mrb[1].mxu0 }
 0x341   : > { %v1100_v21 = vadd.f32 %v1356_v15, %v1099_v20  ;;  %v1526_v22 = vpop.f32.mrb[2].mxu0 }
 0x342   : > { %v1111_v24 = vadd.f32 %v1526_v22, %v1356_v15  ;;  %v1102_v25 = vpop.f32.mrb[3].mxu0  ;;  %v1164_v27 = vmax.f32 %v1108_v18, 0.0 }
 0x343   : > { %v1103_v26 = vadd.f32 %v1356_v15, %v1102_v25  ;;  %v1162_v30 = vmax.f32 %v1100_v21, 0.0 }
 0x344   : > { %v1165_v29 = vmax.f32 %v1111_v24, 0.0 }
 0x345   : > { %v1163_v31 = vmax.f32 %v1103_v26, 0.0 }
 0x346   : > { %v1180_v32 = vpack.c.bf16 %v1165_v29, %v1164_v27 }
 0x347   : > { %v1529_v33 = vpop.f32.mrb[4].mxu0  ;;  %v1179_v34 = vpack.c.bf16 %v1163_v31, %v1162_v30 }
 0x348   : > { %v1124_v35 = vadd.f32 %v1529_v33, %v1356_v15  ;;  %v1115_v36 = vpop.f32.mrb[5].mxu0 }
 0x349   : > { %v1116_v37 = vadd.f32 %v1356_v15, %v1115_v36  ;;  %v1530_v38 = vpop.f32.mrb[6].mxu0  ;;  %1540 = vmatpush3.bf16.msra.mxu1 %v1179_v34 }
 0x34a   : > { %v1127_v39 = vadd.f32 %v1530_v38, %v1356_v15  ;;  %v1118_v9 = vpop.f32.mrb[7].mxu0  ;;  %1541 = vmatprep.subr.bf16.mxu1 %v1814_v11  ;;  %v1168_v41 = vmax.f32 %v1124_v35, 0.0 }
 0x34b   : > { %v1119_v40 = vadd.f32 %v1356_v15, %v1118_v9  ;;  %v1166_v43 = vmax.f32 %v1116_v37, 0.0 }
 0x34c   : > { %v1169_v42 = vmax.f32 %v1127_v39, 0.0 }
 0x34d   : > { %v1167_v44 = vmax.f32 %v1119_v40, 0.0  ;;  %1542 = vmatpush3.bf16.msra.mxu1 %v1180_v32 }
 0x34e   : > { %v1182_v45 = vpack.c.bf16 %v1169_v42, %v1168_v41  ;;  %1543 = vmatprep.subr.bf16.mxu1 %v1814_v11 }
 0x34f   : > { %v1181_v46 = vpack.c.bf16 %v1167_v44, %v1166_v43  ;;  %v1533_v47 = vpop.f32.mrb[8].mxu0 }
 0x350   : > { %v1140_v48 = vadd.f32 %v1533_v47, %v1356_v15  ;;  %v1131_v49 = vpop.f32.mrb[9].mxu0 }
 0x351   : > { %v1132_v13 = vadd.f32 %v1356_v15, %v1131_v49  ;;  %v1534_v50 = vpop.f32.mrb[10].mxu0  ;;  %1544 = vmatpush3.bf16.msra.mxu1 %v1181_v46 }
 0x352   : > { %v1143_v51 = vadd.f32 %v1534_v50, %v1356_v15  ;;  %v1134_v52 = vpop.f32.mrb[11].mxu0  ;;  %1545 = vmatprep.subr.bf16.mxu1 %v1814_v11  ;;  %v1172_v53 = vmax.f32 %v1140_v48, 0.0 }
 0x353   : > { %v1135_v16 = vadd.f32 %v1356_v15, %v1134_v52  ;;  %v1170_v55 = vmax.f32 %v1132_v13, 0.0 }
 0x354   : > { %v1173_v54 = vmax.f32 %v1143_v51, 0.0 }
 0x355   : > { %v1171_v57 = vmax.f32 %v1135_v16, 0.0  ;;  %1546 = vmatpush3.bf16.msra.mxu1 %v1182_v45 }
 0x356   : > { %v1184_v58 = vpack.c.bf16 %v1173_v54, %v1172_v53  ;;  %1547 = vmatprep.subr.bf16.mxu1 %v1814_v11 }
 0x357   : > { %v1183_v19 = vpack.c.bf16 %v1171_v57, %v1170_v55  ;;  %v1537_v23 = vpop.f32.mrb[12].mxu0 }
 0x358   : > { %v1156_v59 = vadd.f32 %v1537_v23, %v1356_v15  ;;  %v1147_v60 = vpop.f32.mrb[13].mxu0 }
 0x359   : > { %v1148_v28 = vadd.f32 %v1356_v15, %v1147_v60  ;;  %v1538_v61 = vpop.f32.mrb[14].mxu0  ;;  %1548 = vmatpush3.bf16.msra.mxu1 %v1183_v19 }
 0x35a   : > { %v1159_v62 = vadd.f32 %v1538_v61, %v1356_v15  ;;  %v1150_v63 = vpop.f32.mrb[15].mxu0  ;;  %1549 = vmatprep.subr.bf16.mxu1 %v1814_v11  ;;  %v1176_v56 = vmax.f32 %v1156_v59, 0.0 }
 0x35b   : > { %v1151_v0 = vadd.f32 %v1356_v15, %v1150_v63  ;;  %v1174_v2 = vmax.f32 %v1148_v28, 0.0 }
 0x35c   : > { %v1177_v1 = vmax.f32 %v1159_v62, 0.0 }
 0x35d   : > { %v1175_v3 = vmax.f32 %v1151_v0, 0.0  ;;  %1550 = vmatpush3.bf16.msra.mxu1 %v1184_v58 }
 0x35e   : > { %v1186_v4 = vpack.c.bf16 %v1177_v1, %v1176_v56  ;;  %1551 = vmatprep.subr.bf16.mxu1 %v1814_v11 }
 0x35f   : > { %v1185_v5 = vpack.c.bf16 %v1175_v3, %v1174_v2 }
 0x361   : > { %1552 = vmatpush3.bf16.msra.mxu1 %v1185_v5 }
 0x362   : > { %1553 = vmatprep.subr.bf16.mxu1 %v1814_v11 }
 0x365   : > { %1554 = vmatpush3.bf16.msra.mxu1 %v1186_v4 }
 0x368   : > { %1556 = vmatmul.mubr.bf16.vlgmr.msra.gmra.mrb[0].mxu1 %v1178_v6 }
 0x43b   : > { %v1221_v8 = vpop.f32.mrb[0].mxu1 }
 0x43c   : > { %v1233_v10 = vmul.f32 %v1231_v7, %v1221_v8  ;;  %v1557_v12 = vpop.f32.mrb[1].mxu1 }
 0x43d   : > { %v1224_v14 = vpop.f32.mrb[2].mxu1 }
 0x43e   : > { %1234 = vst [vmem:[#allocation8] sm:$0xff] %v1233_v10  ;;  %v1558_v15 = vpop.f32.mrb[3].mxu1 }
 0x43f PF: > { %p1596_p5 = scmp.eq.s32.totalorder %s1887_s13, 1  ;;  %s1817_s25 = smov [#allocation8]  }
 0x440   : > { %s1242_s17 = sshll.u32 %s1817_s25, 4  ;;  %s1243_s17 = int_to_ptr.vmem [resolvable:$true] %s1242_s17 }
 0x441   : > { %s1739_s23 = scalar_lea.vmem %s1243_s17, 128  ;;  %p1746_p12 = scmp.lt.s32.totalorder %s1243_s17, %s1243_s17 }
 0x442   : > { %p1740_p6 = scmp.ne.s32.totalorder %s1243_s17, %s1739_s23  ;;  %p1747_p0 = scmp.lt.s32.totalorder %s1739_s23, %s1739_s23 }
 0x444   : > { %p1741_p9 = pnand %p1740_p6, %p1596_p5  ;;  %p1748_p2 = por %p1747_p0, %p1746_p12 }
 0x446   : > { %p1742_p10 = pneg %p1741_p9 }
 0x448   : > { %p1749_p11 = pnand %p1748_p2, %p1742_p10 }
 0x44a   : > { %1752 = shalt.err (!%p1749_p11)
}
 0x44b   : > { %s1753_s27 = scalar_lea.hbm %s2245_s9, 128 }
 0x44c   : > { %p1754_p13 = scmp.ne.s32.totalorder %s2245_s9, %s1753_s27  ;;  %p1759_p7 = scmp.lt.u32.totalorder %s1753_s27, %s2245_s9 }
 0x44e   : > { %p1755_p3 = pnand %p1754_p13, %p1596_p5 }
 0x450   : > { %p1756_p8 = pneg %p1755_p3 }
 0x452   : > { %p1761_p1 = pnand %p1759_p7, %p1756_p8 }
 0x454   : > { %1764 = shalt.err (!%p1761_p1)
}
 0x455   : > { %1582 = dma.vmem_to_hbm [thread:$0]  (%p1596_p5), %s1243_s17, 128, %s2245_s9, [#allocation5]  }
 0x456   : > { %1790 = dma.done.wait (%p1596_p5), [#allocation5], 128  }
 0x457   : > { %1792 = vsyncadd (%p1596_p5), [#allocation5], 4294967168 }
 0x458 PF: > { %p21_p4 = scmp.ge.s32.totalorder %s1913_s19, 4   ;;  %s2258_s30 = smov %s1799_s10 }
 0x459   : > { %s2259_s10 = smov %s1803_s11  ;;  %s2260_s11 = smov %s1942_s24 }
 0x45a   : > { %s2261_s12 = smov %s1913_s19  ;;  %23 = sbr.rel (!%p21_p4) target bundleno = 5 (0x5), region = 108 }
 0x461   :  { %1255 = vsyncpa [#allocation4], 1 }
 0x462   :  { %1257 = vsyncpa [#allocation4 + $0x1], 1 }
 0x463   :  { %1258 = vsyncpa [#allocation7], 1 }
 0x464   :  { %1259 = vsyncpa [#allocation5], 1 }
 0x465   :  { %1261 = vsyncpa [#allocation5 + $0x1], 1 }

</bundles_post_ra>
